<compile_context>
chip_gen: v5e
topology: v5e:2x2
jax: 0.10.0
libtpu: 0.0.40
codegen_flags: <defaults>
</compile_context>

<pallas_src>
import jax
import jax.numpy as jnp
from jax.experimental import pallas as pl
from jax.experimental.pallas import tpu as pltpu

SELU_ALPHA = 1.6732632423543772848170429916717
SELU_SCALE = 1.0507009873554804934193349852946
DROP_P = 0.2
NORM_EPS = 1e-12

# Conv stack geometry of the PyTorch module.  Input length must be 50 so the
# flattened conv3 output has 32 * 5 = 160 features (lin1's input size).
L_IN = 50
C1, K1, S1 = 128, 8, 2
C2, K2, S2 = 64, 4, 2
C3, K3, S3 = 32, 2, 2
L1 = (L_IN - K1) // S1 + 1        # 22
L2 = (L1 - K2) // S2 + 1          # 10
L3 = (L2 - K3) // S3 + 1          # 5
# Per-example activation row counts, padded so each stage is exactly
# `stride x` the next one.  That makes every per-tap read a single strided
# slice across ALL examples and makes each stage's matmul output land directly
# in the next stage's padded layout (no scatter, no concat).
P3 = 8                            # >= L3, multiple of 8
P2 = S3 * P3                      # 16 >= L2
P1 = S2 * P2                      # 32 >= L1
FLAT = C3 * L3                    # 160
H1, H2, N_OUT = 64, 32, 2
OUT_PAD = 128                     # lane-dense output width (sliced to 2 outside)


# ---------------------------------------------------------------------------
# In-kernel helpers
# ---------------------------------------------------------------------------
def _selu(x):
    return SELU_SCALE * jnp.where(x > 0, x, SELU_ALPHA * (jnp.exp(x) - 1.0))


def _relu_l2norm(z):
    # F.normalize(F.relu(z), dim=channels); channels live on the lane axis.
    # v * rsqrt(max(sum v^2, eps^2)) == v / max(||v||_2, eps)  (eps = 1e-12).
    z = jnp.maximum(z, 0.0)
    ss = jnp.sum(z * z, axis=-1, keepdims=True)
    return z * jax.lax.rsqrt(jnp.maximum(ss, NORM_EPS * NORM_EPS))


def _make_kernel(bb):
    """Fused conv1+conv2+conv3+MLP kernel for a batch block of `bb` examples."""

    def kernel(p_ref, w1_ref, b1_ref, w2_ref, b2_ref, w3_ref, b3_ref,
               lw1_ref, lb1_ref, lw2_ref, lb2_ref, lw3_ref, lb3_ref,
               m1_ref, m2_ref, o_ref, y1_s, y2_s, y3_s):
        f32, bf16 = jnp.float32, jnp.bfloat16

        # ---- conv1: one matmul over the wrapper-built, row-padded patches.
        z1 = jnp.dot(p_ref[...], w1_ref[...], preferred_element_type=f32)
        y1_s[pl.ds(0, bb * P1), :] = _relu_l2norm(z1 + b1_ref[...])
        # Zero guard rows so the collapsed strided tap reads stay in-bounds
        # and finite (they only feed rows that are never consumed).
        y1_s[pl.ds(bb * P1, 8), :] = jnp.zeros((8, C1), f32)

        # ---- conv2: per-tap accumulation; one strided read per tap.
        z2 = jnp.zeros((bb * P2, C2), f32)
        for k in range(K2):
            tap = y1_s[pl.ds(k, bb * P2, stride=S2), :].astype(bf16)
            z2 += jnp.dot(tap, w2_ref[k * C1:(k + 1) * C1, :],
                          preferred_element_type=f32)
        y2_s[...] = _relu_l2norm(z2 + b2_ref[...])

        # ---- conv3: same per-tap scheme.
        z3 = jnp.zeros((bb * P3, C3), f32)
        for k in range(K3):
            tap = y2_s[pl.ds(k, bb * P3, stride=S3), :].astype(bf16)
            z3 += jnp.dot(tap, w3_ref[k * C2:(k + 1) * C2, :],
                          preferred_element_type=f32)
        y3_s[...] = _relu_l2norm(z3 + b3_ref[...])

        # ---- flatten + lin1 as per-position accumulation (lw1 is l-major,
        # absorbing torch's channel-major flatten order).
        h = jnp.zeros((bb, H1), f32)
        for l in range(L3):
            part = y3_s[pl.ds(l, bb, stride=P3), :].astype(bf16)
            h += jnp.dot(part, lw1_ref[l * C3:(l + 1) * C3, :],
                         preferred_element_type=f32)
        h = _selu(h + lb1_ref[...]) * m1_ref[...]

        # ---- lin2 + dropout + output head (padded to 128 lanes).
        h = _selu(jnp.dot(h.astype(bf16), lw2_ref[...],
                          preferred_element_type=f32) + lb2_ref[...])
        h = h * m2_ref[...]
        o_ref[...] = jnp.dot(h.astype(bf16), lw3_ref[...],
                             preferred_element_type=f32) + lb3_ref[...]

    return kernel


# ---------------------------------------------------------------------------
# Wrapper: layout plumbing + the single pallas_call
# ---------------------------------------------------------------------------
def _pick_bb(b_pad):
    """Largest multiple-of-8 divisor of b_pad, capped at 256 (fits v7x's 64 MiB
    VMEM with bf16 operands) and, when the batch allows >= 2 blocks, at
    b_pad // 2 so both v7x TensorCores get work."""
    cap = 256
    if b_pad >= 16:
        cap = min(cap, b_pad // 2)
    best, d = 8, 8
    while d <= cap:
        if b_pad % d == 0:
            best = d
        d += 8
    return best


def regressor_forward(x_ncl, params, dropout_key):
    """Forward pass matching Regressor.forward.  x_ncl: (B, channels, 50)."""
    b, c, l_in = x_ncl.shape
    assert l_in == L_IN, "input length must give 160 flat features"

    # Pad batch to a multiple of 8 so every block is sublane-aligned.
    b_pad = ((b + 7) // 8) * 8
    bb = _pick_bb(b_pad)
    grid = (b_pad // bb,)

    x_pad = jnp.pad(x_ncl.astype(jnp.float32), ((0, b_pad - b), (0, 0), (0, 0)))
    x_t = jnp.transpose(x_pad, (0, 2, 1))                       # (b_pad, L, C)

    # conv1 im2col in XLA: feature index is k-major (k*C + c) to match the
    # kernel's conv weight layout; rows padded from 22 -> P1 = 32 per example.
    patches = jnp.concatenate(
        [x_t[:, k:k + S1 * L1:S1, :] for k in range(K1)], axis=-1)  # (b_pad, 22, K1*C)
    patches = jnp.pad(patches, ((0, 0), (0, P1 - L1), (0, 0)))
    patches = patches.reshape(b_pad * P1, K1 * c).astype(jnp.bfloat16)

    # Dropout is live in this forward pass (F.dropout defaults training=True).
    kd1, kd2 = jax.random.split(dropout_key)
    keep = 1.0 - DROP_P
    m1 = jax.random.bernoulli(kd1, keep, (b_pad, H1)).astype(jnp.float32) / keep
    m2 = jax.random.bernoulli(kd2, keep, (b_pad, H2)).astype(jnp.float32) / keep

    def batch_spec(rows, cols):
        return pl.BlockSpec((rows, cols), lambda i: (i, 0))

    def full_spec(arr):
        shape = arr.shape
        return pl.BlockSpec(shape, lambda i: (0,) * len(shape))

    w_names = ("w1", "b1", "w2", "b2", "w3", "b3",
               "lw1", "lb1", "lw2", "lb2", "lw3", "lb3")
    w_args = [params[k] for k in w_names]

    in_specs = ([batch_spec(bb * P1, K1 * c)]
                + [full_spec(a) for a in w_args]
                + [batch_spec(bb, H1), batch_spec(bb, H2)])

    out = pl.pallas_call(
        _make_kernel(bb),
        out_shape=jax.ShapeDtypeStruct((b_pad, OUT_PAD), jnp.float32),
        grid=grid,
        in_specs=in_specs,
        out_specs=batch_spec(bb, OUT_PAD),
        scratch_shapes=[
            pltpu.VMEM((bb * P1 + 8, C1), jnp.float32),   # conv1 acts (+guard)
            pltpu.VMEM((bb * P2, C2), jnp.float32),       # conv2 acts
            pltpu.VMEM((bb * P3, C3), jnp.float32),       # conv3 acts
        ],
        compiler_params=pltpu.CompilerParams(
            dimension_semantics=("parallel",)),
    )(patches, *w_args, m1, m2)

    return out[:b, :N_OUT]


# ---------------------------------------------------------------------------
# Parameters: PyTorch-style init + conversion to the kernel's matmul layouts
# ---------------------------------------------------------------------------
def init_torch_params(key, channels):
    """PyTorch default init: uniform(+-1/sqrt(fan_in)); torch layouts
    (conv: (O, C, K), linear: (out, in))."""
    ks = jax.random.split(key, 12)

    def u(k, shape, fan_in):
        bound = float(fan_in) ** -0.5
        return jax.random.uniform(k, shape, jnp.float32, -bound, bound)

    p = {}
    c_in = channels
    for i, (c_out, ksz) in enumerate(((C1, K1), (C2, K2), (C3, K3)), start=1):
        fan_in = c_in * ksz
        p[f"conv{i}_w"] = u(ks[2 * i - 2], (c_out, c_in, ksz), fan_in)
        p[f"conv{i}_b"] = u(ks[2 * i - 1], (c_out,), fan_in)
        c_in = c_out
    for j, (name, o, i_) in enumerate((("lin1", H1, FLAT),
                                       ("lin2", H2, H1),
                                       ("out", N_OUT, H2))):
        p[f"{name}_w"] = u(ks[6 + 2 * j], (o, i_), i_)
        p[f"{name}_b"] = u(ks[7 + 2 * j], (o,), i_)
    return p


def prepare_params(tp):
    """Torch layouts -> kernel layouts: k-major (K*C_in, C_out) conv matrices,
    l-major lin1 (absorbs torch's channel-major flatten), bf16 matmul weights,
    f32 biases, and an output head padded to 128 lanes."""
    def conv_mat(w):                       # (O, C, K) -> (K*C, O), bf16
        return (jnp.transpose(w, (2, 1, 0))
                .reshape(-1, w.shape[0]).astype(jnp.bfloat16))

    def row(v, pad_to=None):
        v = v.reshape(1, -1)
        if pad_to is not None:
            v = jnp.pad(v, ((0, 0), (0, pad_to - v.shape[1])))
        return v.astype(jnp.float32)

    lw1 = tp["lin1_w"]                     # (64, 160), feature f = c*L3 + l
    lw1 = jnp.transpose(lw1.reshape(H1, C3, L3), (2, 1, 0)).reshape(L3 * C3, H1)

    lw3 = jnp.pad(tp["out_w"].T, ((0, 0), (0, OUT_PAD - N_OUT)))   # (32, 128)

    return dict(
        w1=conv_mat(tp["conv1_w"]), b1=row(tp["conv1_b"]),
        w2=conv_mat(tp["conv2_w"]), b2=row(tp["conv2_b"]),
        w3=conv_mat(tp["conv3_w"]), b3=row(tp["conv3_b"]),
        lw1=lw1.astype(jnp.bfloat16), lb1=row(tp["lin1_b"]),
        lw2=tp["lin2_w"].T.astype(jnp.bfloat16), lb2=row(tp["lin2_b"]),
        lw3=lw3.astype(jnp.bfloat16), lb3=row(tp["out_b"], pad_to=OUT_PAD),
    )


if __name__ == "__main__":
    key = jax.random.PRNGKey(0)
    kx, kp, kd = jax.random.split(key, 3)

    # Input length 50 -> conv lengths 22 -> 10 -> 5; flatten 32*5 = 160 = lin1 in.
    B, C = 2, 4
    x = jax.random.normal(kx, (B, C, L_IN), jnp.float32)
    params = prepare_params(init_torch_params(kp, C))

    fwd = jax.jit(regressor_forward)
    out = jax.block_until_ready(fwd(x, params, kd))

    assert out.shape == (B, N_OUT), out.shape
    assert bool(jnp.all(jnp.isfinite(out)))
    print("KERNEL_OK")
</pallas_src>

<mosaic_0001>
module attributes {stable_mosaic.version = 11 : i64} {
  func.func @kernel(%arg0: i32, %arg1: memref<256x32xbf16, #tpu.memory_space<vmem>>, %arg2: memref<32x128xbf16, #tpu.memory_space<vmem>>, %arg3: memref<1x128xf32, #tpu.memory_space<vmem>>, %arg4: memref<512x64xbf16, #tpu.memory_space<vmem>>, %arg5: memref<1x64xf32, #tpu.memory_space<vmem>>, %arg6: memref<128x32xbf16, #tpu.memory_space<vmem>>, %arg7: memref<1x32xf32, #tpu.memory_space<vmem>>, %arg8: memref<160x64xbf16, #tpu.memory_space<vmem>>, %arg9: memref<1x64xf32, #tpu.memory_space<vmem>>, %arg10: memref<64x32xbf16, #tpu.memory_space<vmem>>, %arg11: memref<1x32xf32, #tpu.memory_space<vmem>>, %arg12: memref<32x128xbf16, #tpu.memory_space<vmem>>, %arg13: memref<1x128xf32, #tpu.memory_space<vmem>>, %arg14: memref<8x64xf32, #tpu.memory_space<vmem>>, %arg15: memref<8x32xf32, #tpu.memory_space<vmem>>, %arg16: memref<8x128xf32, #tpu.memory_space<vmem>>, %arg17: memref<264x128xf32, #tpu.memory_space<vmem>>, %arg18: memref<128x64xf32, #tpu.memory_space<vmem>>, %arg19: memref<64x32xf32, #tpu.memory_space<vmem>>) attributes {dimension_semantics = [#tpu.dimension_semantics<parallel>], iteration_bounds = array<i64: 1>, scalar_prefetch = 0 : i64, scratch_operands = 3 : i64, tpu.core_type = #tpu.core_type<tc>, window_params = [{transform_indices = @transform_0, window_bounds = array<i64: 256, 32>}, {pipeline_mode = #tpu.pipeline_mode<synchronous>, transform_indices = @transform_1, window_bounds = array<i64: 32, 128>}, {pipeline_mode = #tpu.pipeline_mode<synchronous>, transform_indices = @transform_2, window_bounds = array<i64: 1, 128>}, {pipeline_mode = #tpu.pipeline_mode<synchronous>, transform_indices = @transform_3, window_bounds = array<i64: 512, 64>}, {pipeline_mode = #tpu.pipeline_mode<synchronous>, transform_indices = @transform_4, window_bounds = array<i64: 1, 64>}, {pipeline_mode = #tpu.pipeline_mode<synchronous>, transform_indices = @transform_5, window_bounds = array<i64: 128, 32>}, {pipeline_mode = #tpu.pipeline_mode<synchronous>, transform_indices = @transform_6, window_bounds = array<i64: 1, 32>}, {pipeline_mode = #tpu.pipeline_mode<synchronous>, transform_indices = @transform_7, window_bounds = array<i64: 160, 64>}, {pipeline_mode = #tpu.pipeline_mode<synchronous>, transform_indices = @transform_8, window_bounds = array<i64: 1, 64>}, {pipeline_mode = #tpu.pipeline_mode<synchronous>, transform_indices = @transform_9, window_bounds = array<i64: 64, 32>}, {pipeline_mode = #tpu.pipeline_mode<synchronous>, transform_indices = @transform_10, window_bounds = array<i64: 1, 32>}, {pipeline_mode = #tpu.pipeline_mode<synchronous>, transform_indices = @transform_11, window_bounds = array<i64: 32, 128>}, {pipeline_mode = #tpu.pipeline_mode<synchronous>, transform_indices = @transform_12, window_bounds = array<i64: 1, 128>}, {transform_indices = @transform_13, window_bounds = array<i64: 8, 64>}, {transform_indices = @transform_14, window_bounds = array<i64: 8, 32>}, {transform_indices = @transform_15, window_bounds = array<i64: 8, 128>}]} {
    %c0 = arith.constant 0 : index
    %c0_0 = arith.constant 0 : index
    %0 = vector.load %arg1[%c0, %c0_0] : memref<256x32xbf16, #tpu.memory_space<vmem>>, vector<256x32xbf16>
    %c0_1 = arith.constant 0 : index
    %c0_2 = arith.constant 0 : index
    %1 = vector.load %arg2[%c0_1, %c0_2] : memref<32x128xbf16, #tpu.memory_space<vmem>>, vector<32x128xbf16>
    %cst = arith.constant dense<0.000000e+00> : vector<256x128xf32>
    %2 = tpu.matmul %0, %1, %cst {dimension_numbers = #tpu.dot_dimension_numbers<[1], [0], [0], [1], [0, 0, 1, 1], [], []>} : vector<256x32xbf16>, vector<32x128xbf16>, vector<256x128xf32> -> vector<256x128xf32>
    %c0_3 = arith.constant 0 : index
    %c0_4 = arith.constant 0 : index
    %3 = vector.load %arg3[%c0_3, %c0_4] : memref<1x128xf32, #tpu.memory_space<vmem>>, vector<1x128xf32>
    %4 = vector.broadcast %3 : vector<1x128xf32> to vector<256x128xf32>
    %5 = arith.addf %2, %4 : vector<256x128xf32>
    %cst_5 = arith.constant 0.000000e+00 : f32
    %6 = vector.broadcast %cst_5 : f32 to vector<256x128xf32>
    %7 = arith.maximumf %5, %6 : vector<256x128xf32>
    %8 = arith.mulf %7, %7 : vector<256x128xf32>
    %cst_6 = arith.constant dense<0.000000e+00> : vector<256xf32>
    %9 = vector.multi_reduction <add>, %8, %cst_6 [1] : vector<256x128xf32> to vector<256xf32>
    %10 = vector.shape_cast %9 : vector<256xf32> to vector<256x1xf32>
    %cst_7 = arith.constant 1.000000e-24 : f32
    %11 = vector.broadcast %cst_7 : f32 to vector<256x1xf32>
    %12 = arith.maximumf %10, %11 : vector<256x1xf32>
    %13 = math.rsqrt %12 : vector<256x1xf32>
    %14 = vector.broadcast %13 : vector<256x1xf32> to vector<256x128xf32>
    %15 = arith.mulf %7, %14 : vector<256x128xf32>
    %c0_8 = arith.constant 0 : index
    %c0_9 = arith.constant 0 : index
    %16 = vector.load %arg17[%c0_8, %c0_9] : memref<264x128xf32, #tpu.memory_space<vmem>>, vector<256x128xf32>
    tpu.vector_store %arg17[%c0_8, %c0_9], %15 {strides = array<i32>} : memref<264x128xf32, #tpu.memory_space<vmem>>, vector<256x128xf32>,
    %cst_10 = arith.constant 0.000000e+00 : f32
    %17 = vector.broadcast %cst_10 : f32 to vector<8x128xf32>
    %c256 = arith.constant 256 : index
    %c0_11 = arith.constant 0 : index
    %18 = vector.load %arg17[%c256, %c0_11] : memref<264x128xf32, #tpu.memory_space<vmem>>, vector<8x128xf32>
    tpu.vector_store %arg17[%c256, %c0_11], %17 {strides = array<i32>} : memref<264x128xf32, #tpu.memory_space<vmem>>, vector<8x128xf32>,
    %cst_12 = arith.constant 0.000000e+00 : f32
    %19 = vector.broadcast %cst_12 : f32 to vector<128x64xf32>
    %c0_13 = arith.constant 0 : index
    %c0_14 = arith.constant 0 : index
    %20 = tpu.strided_load %arg17[%c0_13, %c0_14] {strides = array<i32: 2, 1>} : memref<264x128xf32, #tpu.memory_space<vmem>>, vector<128x128xf32>
    %21 = arith.truncf %20 : vector<128x128xf32> to vector<128x128xbf16>
    %c0_15 = arith.constant 0 : index
    %c0_16 = arith.constant 0 : index
    %22 = vector.load %arg4[%c0_15, %c0_16] : memref<512x64xbf16, #tpu.memory_space<vmem>>, vector<128x64xbf16>
    %cst_17 = arith.constant dense<0.000000e+00> : vector<128x64xf32>
    %23 = tpu.matmul %21, %22, %cst_17 {dimension_numbers = #tpu.dot_dimension_numbers<[1], [0], [0], [1], [0, 0, 1, 1], [], []>} : vector<128x128xbf16>, vector<128x64xbf16>, vector<128x64xf32> -> vector<128x64xf32>
    %24 = arith.addf %19, %23 : vector<128x64xf32>
    %c1 = arith.constant 1 : index
    %c0_18 = arith.constant 0 : index
    %25 = tpu.strided_load %arg17[%c1, %c0_18] {strides = array<i32: 2, 1>} : memref<264x128xf32, #tpu.memory_space<vmem>>, vector<128x128xf32>
    %26 = arith.truncf %25 : vector<128x128xf32> to vector<128x128xbf16>
    %c128 = arith.constant 128 : index
    %c0_19 = arith.constant 0 : index
    %27 = vector.load %arg4[%c128, %c0_19] : memref<512x64xbf16, #tpu.memory_space<vmem>>, vector<128x64xbf16>
    %cst_20 = arith.constant dense<0.000000e+00> : vector<128x64xf32>
    %28 = tpu.matmul %26, %27, %cst_20 {dimension_numbers = #tpu.dot_dimension_numbers<[1], [0], [0], [1], [0, 0, 1, 1], [], []>} : vector<128x128xbf16>, vector<128x64xbf16>, vector<128x64xf32> -> vector<128x64xf32>
    %29 = arith.addf %24, %28 : vector<128x64xf32>
    %c2 = arith.constant 2 : index
    %c0_21 = arith.constant 0 : index
    %30 = tpu.strided_load %arg17[%c2, %c0_21] {strides = array<i32: 2, 1>} : memref<264x128xf32, #tpu.memory_space<vmem>>, vector<128x128xf32>
    %31 = arith.truncf %30 : vector<128x128xf32> to vector<128x128xbf16>
    %c256_22 = arith.constant 256 : index
    %c0_23 = arith.constant 0 : index
    %32 = vector.load %arg4[%c256_22, %c0_23] : memref<512x64xbf16, #tpu.memory_space<vmem>>, vector<128x64xbf16>
    %cst_24 = arith.constant dense<0.000000e+00> : vector<128x64xf32>
    %33 = tpu.matmul %31, %32, %cst_24 {dimension_numbers = #tpu.dot_dimension_numbers<[1], [0], [0], [1], [0, 0, 1, 1], [], []>} : vector<128x128xbf16>, vector<128x64xbf16>, vector<128x64xf32> -> vector<128x64xf32>
    %34 = arith.addf %29, %33 : vector<128x64xf32>
    %c3 = arith.constant 3 : index
    %c0_25 = arith.constant 0 : index
    %35 = tpu.strided_load %arg17[%c3, %c0_25] {strides = array<i32: 2, 1>} : memref<264x128xf32, #tpu.memory_space<vmem>>, vector<128x128xf32>
    %36 = arith.truncf %35 : vector<128x128xf32> to vector<128x128xbf16>
    %c384 = arith.constant 384 : index
    %c0_26 = arith.constant 0 : index
    %37 = vector.load %arg4[%c384, %c0_26] : memref<512x64xbf16, #tpu.memory_space<vmem>>, vector<128x64xbf16>
    %cst_27 = arith.constant dense<0.000000e+00> : vector<128x64xf32>
    %38 = tpu.matmul %36, %37, %cst_27 {dimension_numbers = #tpu.dot_dimension_numbers<[1], [0], [0], [1], [0, 0, 1, 1], [], []>} : vector<128x128xbf16>, vector<128x64xbf16>, vector<128x64xf32> -> vector<128x64xf32>
    %39 = arith.addf %34, %38 : vector<128x64xf32>
    %c0_28 = arith.constant 0 : index
    %c0_29 = arith.constant 0 : index
    %40 = vector.load %arg5[%c0_28, %c0_29] : memref<1x64xf32, #tpu.memory_space<vmem>>, vector<1x64xf32>
    %41 = vector.broadcast %40 : vector<1x64xf32> to vector<128x64xf32>
    %42 = arith.addf %39, %41 : vector<128x64xf32>
    %cst_30 = arith.constant 0.000000e+00 : f32
    %43 = vector.broadcast %cst_30 : f32 to vector<128x64xf32>
    %44 = arith.maximumf %42, %43 : vector<128x64xf32>
    %45 = arith.mulf %44, %44 : vector<128x64xf32>
    %cst_31 = arith.constant dense<0.000000e+00> : vector<128xf32>
    %46 = vector.multi_reduction <add>, %45, %cst_31 [1] : vector<128x64xf32> to vector<128xf32>
    %47 = vector.shape_cast %46 : vector<128xf32> to vector<128x1xf32>
    %cst_32 = arith.constant 1.000000e-24 : f32
    %48 = vector.broadcast %cst_32 : f32 to vector<128x1xf32>
    %49 = arith.maximumf %47, %48 : vector<128x1xf32>
    %50 = math.rsqrt %49 : vector<128x1xf32>
    %51 = vector.broadcast %50 : vector<128x1xf32> to vector<128x64xf32>
    %52 = arith.mulf %44, %51 : vector<128x64xf32>
    %c0_33 = arith.constant 0 : index
    %c0_34 = arith.constant 0 : index
    %53 = vector.load %arg18[%c0_33, %c0_34] : memref<128x64xf32, #tpu.memory_space<vmem>>, vector<128x64xf32>
    tpu.vector_store %arg18[%c0_33, %c0_34], %52 {strides = array<i32>} : memref<128x64xf32, #tpu.memory_space<vmem>>, vector<128x64xf32>,
    %cst_35 = arith.constant 0.000000e+00 : f32
    %54 = vector.broadcast %cst_35 : f32 to vector<64x32xf32>
    %c0_36 = arith.constant 0 : index
    %c0_37 = arith.constant 0 : index
    %55 = tpu.strided_load %arg18[%c0_36, %c0_37] {strides = array<i32: 2, 1>} : memref<128x64xf32, #tpu.memory_space<vmem>>, vector<64x64xf32>
    %56 = arith.truncf %55 : vector<64x64xf32> to vector<64x64xbf16>
    %c0_38 = arith.constant 0 : index
    %c0_39 = arith.constant 0 : index
    %57 = vector.load %arg6[%c0_38, %c0_39] : memref<128x32xbf16, #tpu.memory_space<vmem>>, vector<64x32xbf16>
    %cst_40 = arith.constant dense<0.000000e+00> : vector<64x32xf32>
    %58 = tpu.matmul %56, %57, %cst_40 {dimension_numbers = #tpu.dot_dimension_numbers<[1], [0], [0], [1], [0, 0, 1, 1], [], []>} : vector<64x64xbf16>, vector<64x32xbf16>, vector<64x32xf32> -> vector<64x32xf32>
    %59 = arith.addf %54, %58 : vector<64x32xf32>
    %c1_41 = arith.constant 1 : index
    %c0_42 = arith.constant 0 : index
    %60 = tpu.strided_load %arg18[%c1_41, %c0_42] {strides = array<i32: 2, 1>} : memref<128x64xf32, #tpu.memory_space<vmem>>, vector<64x64xf32>
    %61 = arith.truncf %60 : vector<64x64xf32> to vector<64x64xbf16>
    %c64 = arith.constant 64 : index
    %c0_43 = arith.constant 0 : index
    %62 = vector.load %arg6[%c64, %c0_43] : memref<128x32xbf16, #tpu.memory_space<vmem>>, vector<64x32xbf16>
    %cst_44 = arith.constant dense<0.000000e+00> : vector<64x32xf32>
    %63 = tpu.matmul %61, %62, %cst_44 {dimension_numbers = #tpu.dot_dimension_numbers<[1], [0], [0], [1], [0, 0, 1, 1], [], []>} : vector<64x64xbf16>, vector<64x32xbf16>, vector<64x32xf32> -> vector<64x32xf32>
    %64 = arith.addf %59, %63 : vector<64x32xf32>
    %c0_45 = arith.constant 0 : index
    %c0_46 = arith.constant 0 : index
    %65 = vector.load %arg7[%c0_45, %c0_46] : memref<1x32xf32, #tpu.memory_space<vmem>>, vector<1x32xf32>
    %66 = vector.broadcast %65 : vector<1x32xf32> to vector<64x32xf32>
    %67 = arith.addf %64, %66 : vector<64x32xf32>
    %cst_47 = arith.constant 0.000000e+00 : f32
    %68 = vector.broadcast %cst_47 : f32 to vector<64x32xf32>
    %69 = arith.maximumf %67, %68 : vector<64x32xf32>
    %70 = arith.mulf %69, %69 : vector<64x32xf32>
    %cst_48 = arith.constant dense<0.000000e+00> : vector<64xf32>
    %71 = vector.multi_reduction <add>, %70, %cst_48 [1] : vector<64x32xf32> to vector<64xf32>
    %72 = vector.shape_cast %71 : vector<64xf32> to vector<64x1xf32>
    %cst_49 = arith.constant 1.000000e-24 : f32
    %73 = vector.broadcast %cst_49 : f32 to vector<64x1xf32>
    %74 = arith.maximumf %72, %73 : vector<64x1xf32>
    %75 = math.rsqrt %74 : vector<64x1xf32>
    %76 = vector.broadcast %75 : vector<64x1xf32> to vector<64x32xf32>
    %77 = arith.mulf %69, %76 : vector<64x32xf32>
    %c0_50 = arith.constant 0 : index
    %c0_51 = arith.constant 0 : index
    %78 = vector.load %arg19[%c0_50, %c0_51] : memref<64x32xf32, #tpu.memory_space<vmem>>, vector<64x32xf32>
    tpu.vector_store %arg19[%c0_50, %c0_51], %77 {strides = array<i32>} : memref<64x32xf32, #tpu.memory_space<vmem>>, vector<64x32xf32>,
    %cst_52 = arith.constant 0.000000e+00 : f32
    %79 = vector.broadcast %cst_52 : f32 to vector<8x64xf32>
    %c0_53 = arith.constant 0 : index
    %c0_54 = arith.constant 0 : index
    %80 = tpu.strided_load %arg19[%c0_53, %c0_54] {strides = array<i32: 8, 1>} : memref<64x32xf32, #tpu.memory_space<vmem>>, vector<8x32xf32>
    %81 = arith.truncf %80 : vector<8x32xf32> to vector<8x32xbf16>
    %c0_55 = arith.constant 0 : index
    %c0_56 = arith.constant 0 : index
    %82 = vector.load %arg8[%c0_55, %c0_56] : memref<160x64xbf16, #tpu.memory_space<vmem>>, vector<32x64xbf16>
    %cst_57 = arith.constant dense<0.000000e+00> : vector<8x64xf32>
    %83 = tpu.matmul %81, %82, %cst_57 {dimension_numbers = #tpu.dot_dimension_numbers<[1], [0], [0], [1], [0, 0, 1, 1], [], []>} : vector<8x32xbf16>, vector<32x64xbf16>, vector<8x64xf32> -> vector<8x64xf32>
    %84 = arith.addf %79, %83 : vector<8x64xf32>
    %c1_58 = arith.constant 1 : index
    %c0_59 = arith.constant 0 : index
    %85 = tpu.strided_load %arg19[%c1_58, %c0_59] {strides = array<i32: 8, 1>} : memref<64x32xf32, #tpu.memory_space<vmem>>, vector<8x32xf32>
    %86 = arith.truncf %85 : vector<8x32xf32> to vector<8x32xbf16>
    %c32 = arith.constant 32 : index
    %c0_60 = arith.constant 0 : index
    %87 = vector.load %arg8[%c32, %c0_60] : memref<160x64xbf16, #tpu.memory_space<vmem>>, vector<32x64xbf16>
    %cst_61 = arith.constant dense<0.000000e+00> : vector<8x64xf32>
    %88 = tpu.matmul %86, %87, %cst_61 {dimension_numbers = #tpu.dot_dimension_numbers<[1], [0], [0], [1], [0, 0, 1, 1], [], []>} : vector<8x32xbf16>, vector<32x64xbf16>, vector<8x64xf32> -> vector<8x64xf32>
    %89 = arith.addf %84, %88 : vector<8x64xf32>
    %c2_62 = arith.constant 2 : index
    %c0_63 = arith.constant 0 : index
    %90 = tpu.strided_load %arg19[%c2_62, %c0_63] {strides = array<i32: 8, 1>} : memref<64x32xf32, #tpu.memory_space<vmem>>, vector<8x32xf32>
    %91 = arith.truncf %90 : vector<8x32xf32> to vector<8x32xbf16>
    %c64_64 = arith.constant 64 : index
    %c0_65 = arith.constant 0 : index
    %92 = vector.load %arg8[%c64_64, %c0_65] : memref<160x64xbf16, #tpu.memory_space<vmem>>, vector<32x64xbf16>
    %cst_66 = arith.constant dense<0.000000e+00> : vector<8x64xf32>
    %93 = tpu.matmul %91, %92, %cst_66 {dimension_numbers = #tpu.dot_dimension_numbers<[1], [0], [0], [1], [0, 0, 1, 1], [], []>} : vector<8x32xbf16>, vector<32x64xbf16>, vector<8x64xf32> -> vector<8x64xf32>
    %94 = arith.addf %89, %93 : vector<8x64xf32>
    %c3_67 = arith.constant 3 : index
    %c0_68 = arith.constant 0 : index
    %95 = tpu.strided_load %arg19[%c3_67, %c0_68] {strides = array<i32: 8, 1>} : memref<64x32xf32, #tpu.memory_space<vmem>>, vector<8x32xf32>
    %96 = arith.truncf %95 : vector<8x32xf32> to vector<8x32xbf16>
    %c96 = arith.constant 96 : index
    %c0_69 = arith.constant 0 : index
    %97 = vector.load %arg8[%c96, %c0_69] : memref<160x64xbf16, #tpu.memory_space<vmem>>, vector<32x64xbf16>
    %cst_70 = arith.constant dense<0.000000e+00> : vector<8x64xf32>
    %98 = tpu.matmul %96, %97, %cst_70 {dimension_numbers = #tpu.dot_dimension_numbers<[1], [0], [0], [1], [0, 0, 1, 1], [], []>} : vector<8x32xbf16>, vector<32x64xbf16>, vector<8x64xf32> -> vector<8x64xf32>
    %99 = arith.addf %94, %98 : vector<8x64xf32>
    %c4 = arith.constant 4 : index
    %c0_71 = arith.constant 0 : index
    %100 = tpu.strided_load %arg19[%c4, %c0_71] {strides = array<i32: 8, 1>} : memref<64x32xf32, #tpu.memory_space<vmem>>, vector<8x32xf32>
    %101 = arith.truncf %100 : vector<8x32xf32> to vector<8x32xbf16>
    %c128_72 = arith.constant 128 : index
    %c0_73 = arith.constant 0 : index
    %102 = vector.load %arg8[%c128_72, %c0_73] : memref<160x64xbf16, #tpu.memory_space<vmem>>, vector<32x64xbf16>
    %cst_74 = arith.constant dense<0.000000e+00> : vector<8x64xf32>
    %103 = tpu.matmul %101, %102, %cst_74 {dimension_numbers = #tpu.dot_dimension_numbers<[1], [0], [0], [1], [0, 0, 1, 1], [], []>} : vector<8x32xbf16>, vector<32x64xbf16>, vector<8x64xf32> -> vector<8x64xf32>
    %104 = arith.addf %99, %103 : vector<8x64xf32>
    %c0_75 = arith.constant 0 : index
    %c0_76 = arith.constant 0 : index
    %105 = vector.load %arg9[%c0_75, %c0_76] : memref<1x64xf32, #tpu.memory_space<vmem>>, vector<1x64xf32>
    %106 = vector.broadcast %105 : vector<1x64xf32> to vector<8x64xf32>
    %107 = arith.addf %104, %106 : vector<8x64xf32>
    %cst_77 = arith.constant 0.000000e+00 : f32
    %108 = vector.broadcast %cst_77 : f32 to vector<8x64xf32>
    %109 = arith.cmpf ogt, %107, %108 : vector<8x64xf32>
    %110 = math.exp %107 : vector<8x64xf32>
    %cst_78 = arith.constant 1.000000e+00 : f32
    %111 = vector.broadcast %cst_78 : f32 to vector<8x64xf32>
    %112 = arith.subf %110, %111 : vector<8x64xf32>
    %cst_79 = arith.constant 1.67326319 : f32
    %113 = vector.broadcast %cst_79 : f32 to vector<8x64xf32>
    %114 = arith.mulf %113, %112 : vector<8x64xf32>
    %115 = arith.select %109, %107, %114 : vector<8x64xi1>, vector<8x64xf32>
    %cst_80 = arith.constant 1.05070102 : f32
    %116 = vector.broadcast %cst_80 : f32 to vector<8x64xf32>
    %117 = arith.mulf %116, %115 : vector<8x64xf32>
    %c0_81 = arith.constant 0 : index
    %c0_82 = arith.constant 0 : index
    %118 = vector.load %arg14[%c0_81, %c0_82] : memref<8x64xf32, #tpu.memory_space<vmem>>, vector<8x64xf32>
    %119 = arith.mulf %117, %118 : vector<8x64xf32>
    %120 = arith.truncf %119 : vector<8x64xf32> to vector<8x64xbf16>
    %c0_83 = arith.constant 0 : index
    %c0_84 = arith.constant 0 : index
    %121 = vector.load %arg10[%c0_83, %c0_84] : memref<64x32xbf16, #tpu.memory_space<vmem>>, vector<64x32xbf16>
    %cst_85 = arith.constant dense<0.000000e+00> : vector<8x32xf32>
    %122 = tpu.matmul %120, %121, %cst_85 {dimension_numbers = #tpu.dot_dimension_numbers<[1], [0], [0], [1], [0, 0, 1, 1], [], []>} : vector<8x64xbf16>, vector<64x32xbf16>, vector<8x32xf32> -> vector<8x32xf32>
    %c0_86 = arith.constant 0 : index
    %c0_87 = arith.constant 0 : index
    %123 = vector.load %arg11[%c0_86, %c0_87] : memref<1x32xf32, #tpu.memory_space<vmem>>, vector<1x32xf32>
    %124 = vector.broadcast %123 : vector<1x32xf32> to vector<8x32xf32>
    %125 = arith.addf %122, %124 : vector<8x32xf32>
    %cst_88 = arith.constant 0.000000e+00 : f32
    %126 = vector.broadcast %cst_88 : f32 to vector<8x32xf32>
    %127 = arith.cmpf ogt, %125, %126 : vector<8x32xf32>
    %128 = math.exp %125 : vector<8x32xf32>
    %cst_89 = arith.constant 1.000000e+00 : f32
    %129 = vector.broadcast %cst_89 : f32 to vector<8x32xf32>
    %130 = arith.subf %128, %129 : vector<8x32xf32>
    %cst_90 = arith.constant 1.67326319 : f32
    %131 = vector.broadcast %cst_90 : f32 to vector<8x32xf32>
    %132 = arith.mulf %131, %130 : vector<8x32xf32>
    %133 = arith.select %127, %125, %132 : vector<8x32xi1>, vector<8x32xf32>
    %cst_91 = arith.constant 1.05070102 : f32
    %134 = vector.broadcast %cst_91 : f32 to vector<8x32xf32>
    %135 = arith.mulf %134, %133 : vector<8x32xf32>
    %c0_92 = arith.constant 0 : index
    %c0_93 = arith.constant 0 : index
    %136 = vector.load %arg15[%c0_92, %c0_93] : memref<8x32xf32, #tpu.memory_space<vmem>>, vector<8x32xf32>
    %137 = arith.mulf %135, %136 : vector<8x32xf32>
    %138 = arith.truncf %137 : vector<8x32xf32> to vector<8x32xbf16>
    %c0_94 = arith.constant 0 : index
    %c0_95 = arith.constant 0 : index
    %139 = vector.load %arg12[%c0_94, %c0_95] : memref<32x128xbf16, #tpu.memory_space<vmem>>, vector<32x128xbf16>
    %cst_96 = arith.constant dense<0.000000e+00> : vector<8x128xf32>
    %140 = tpu.matmul %138, %139, %cst_96 {dimension_numbers = #tpu.dot_dimension_numbers<[1], [0], [0], [1], [0, 0, 1, 1], [], []>} : vector<8x32xbf16>, vector<32x128xbf16>, vector<8x128xf32> -> vector<8x128xf32>
    %c0_97 = arith.constant 0 : index
    %c0_98 = arith.constant 0 : index
    %141 = vector.load %arg13[%c0_97, %c0_98] : memref<1x128xf32, #tpu.memory_space<vmem>>, vector<1x128xf32>
    %142 = vector.broadcast %141 : vector<1x128xf32> to vector<8x128xf32>
    %143 = arith.addf %140, %142 : vector<8x128xf32>
    %c0_99 = arith.constant 0 : index
    %c0_100 = arith.constant 0 : index
    %144 = vector.load %arg16[%c0_99, %c0_100] : memref<8x128xf32, #tpu.memory_space<vmem>>, vector<8x128xf32>
    tpu.vector_store %arg16[%c0_99, %c0_100], %143 {strides = array<i32>} : memref<8x128xf32, #tpu.memory_space<vmem>>, vector<8x128xf32>,
    return
  }
  func.func @transform_0(%arg0: i32) -> (i32, i32) {
    %c0_i32 = arith.constant 0 : i32
    %c0_i32_0 = arith.constant 0 : i32
    return %arg0, %c0_i32 : i32, i32
  }
  func.func @transform_1(%arg0: i32) -> (i32, i32) {
    %c0_i32 = arith.constant 0 : i32
    %c0_i32_0 = arith.constant 0 : i32
    %c0_i32_1 = arith.constant 0 : i32
    return %c0_i32, %c0_i32_0 : i32, i32
  }
  func.func @transform_2(%arg0: i32) -> (i32, i32) {
    %c0_i32 = arith.constant 0 : i32
    %c0_i32_0 = arith.constant 0 : i32
    %c0_i32_1 = arith.constant 0 : i32
    return %c0_i32, %c0_i32_0 : i32, i32
  }
  func.func @transform_3(%arg0: i32) -> (i32, i32) {
    %c0_i32 = arith.constant 0 : i32
    %c0_i32_0 = arith.constant 0 : i32
    %c0_i32_1 = arith.constant 0 : i32
    return %c0_i32, %c0_i32_0 : i32, i32
  }
  func.func @transform_4(%arg0: i32) -> (i32, i32) {
    %c0_i32 = arith.constant 0 : i32
    %c0_i32_0 = arith.constant 0 : i32
    %c0_i32_1 = arith.constant 0 : i32
    return %c0_i32, %c0_i32_0 : i32, i32
  }
  func.func @transform_5(%arg0: i32) -> (i32, i32) {
    %c0_i32 = arith.constant 0 : i32
    %c0_i32_0 = arith.constant 0 : i32
    %c0_i32_1 = arith.constant 0 : i32
    return %c0_i32, %c0_i32_0 : i32, i32
  }
  func.func @transform_6(%arg0: i32) -> (i32, i32) {
    %c0_i32 = arith.constant 0 : i32
    %c0_i32_0 = arith.constant 0 : i32
    %c0_i32_1 = arith.constant 0 : i32
    return %c0_i32, %c0_i32_0 : i32, i32
  }
  func.func @transform_7(%arg0: i32) -> (i32, i32) {
    %c0_i32 = arith.constant 0 : i32
    %c0_i32_0 = arith.constant 0 : i32
    %c0_i32_1 = arith.constant 0 : i32
    return %c0_i32, %c0_i32_0 : i32, i32
  }
  func.func @transform_8(%arg0: i32) -> (i32, i32) {
    %c0_i32 = arith.constant 0 : i32
    %c0_i32_0 = arith.constant 0 : i32
    %c0_i32_1 = arith.constant 0 : i32
    return %c0_i32, %c0_i32_0 : i32, i32
  }
  func.func @transform_9(%arg0: i32) -> (i32, i32) {
    %c0_i32 = arith.constant 0 : i32
    %c0_i32_0 = arith.constant 0 : i32
    %c0_i32_1 = arith.constant 0 : i32
    return %c0_i32, %c0_i32_0 : i32, i32
  }
  func.func @transform_10(%arg0: i32) -> (i32, i32) {
    %c0_i32 = arith.constant 0 : i32
    %c0_i32_0 = arith.constant 0 : i32
    %c0_i32_1 = arith.constant 0 : i32
    return %c0_i32, %c0_i32_0 : i32, i32
  }
  func.func @transform_11(%arg0: i32) -> (i32, i32) {
    %c0_i32 = arith.constant 0 : i32
    %c0_i32_0 = arith.constant 0 : i32
    %c0_i32_1 = arith.constant 0 : i32
    return %c0_i32, %c0_i32_0 : i32, i32
  }
  func.func @transform_12(%arg0: i32) -> (i32, i32) {
    %c0_i32 = arith.constant 0 : i32
    %c0_i32_0 = arith.constant 0 : i32
    %c0_i32_1 = arith.constant 0 : i32
    return %c0_i32, %c0_i32_0 : i32, i32
  }
  func.func @transform_13(%arg0: i32) -> (i32, i32) {
    %c0_i32 = arith.constant 0 : i32
    %c0_i32_0 = arith.constant 0 : i32
    return %arg0, %c0_i32 : i32, i32
  }
  func.func @transform_14(%arg0: i32) -> (i32, i32) {
    %c0_i32 = arith.constant 0 : i32
    %c0_i32_0 = arith.constant 0 : i32
    return %arg0, %c0_i32 : i32, i32
  }
  func.func @transform_15(%arg0: i32) -> (i32, i32) {
    %c0_i32 = arith.constant 0 : i32
    %c0_i32_0 = arith.constant 0 : i32
    return %arg0, %c0_i32 : i32, i32
  }
}

</mosaic_0001>

<bundles_post_ra>
// kernel: regressor_forward.3
= control target key start
LH: loop header
LB: loop body
LE: loop exit
PB: predicated region body
PF: predicated region fallthrough
CT: control target
= control target key end

     0   :  { %vm183_vm0 = vcmask 261120   ;;  %s3773_s1 = inlined_call_operand.vmem [shape: bf16[32,128], index: 1, kind: input, shape index: {}]   ;;  %s3774_s2 = inlined_call_operand.vmem [shape: f32[1,128], index: 2, kind: input, shape index: {}]   ;;  %s3775_s0 = inlined_call_operand.vmem [shape: bf16[256,32], index: 0, kind: input, shape index: {}]   ;;  %s3776_s3 = inlined_call_operand.vmem [shape: bf16[512,64], index: 3, kind: input, shape index: {}]   ;;  %s3777_s4 = inlined_call_operand.vmem [shape: f32[1,64], index: 4, kind: input, shape index: {}]   ;;  %s3778_s5 = inlined_call_operand.vmem [shape: bf16[128,32], index: 5, kind: input, shape index: {}]   ;;  %s3779_s6 = inlined_call_operand.vmem [shape: f32[1,32], index: 6, kind: input, shape index: {}]   ;;  %s3780_s7 = inlined_call_operand.vmem [shape: bf16[160,64], index: 7, kind: input, shape index: {}]   ;;  %s3781_s11 = inlined_call_operand.vmem [shape: bf16[32,128], index: 11, kind: input, shape index: {}]   ;;  %s3782_s8 = inlined_call_operand.vmem [shape: f32[1,64], index: 8, kind: input, shape index: {}]   ;;  %s3783_s10 = inlined_call_operand.vmem [shape: f32[1,32], index: 10, kind: input, shape index: {}]   ;;  %s3784_s9 = inlined_call_operand.vmem [shape: bf16[64,32], index: 9, kind: input, shape index: {}]   ;;  %s3785_s13 = inlined_call_operand.vmem [shape: f32[8,64], index: 13, kind: input, shape index: {}]   ;;  %s3786_s12 = inlined_call_operand.vmem [shape: f32[1,128], index: 12, kind: input, shape index: {}]   ;;  %s3787_s14 = inlined_call_operand.vmem [shape: f32[8,32], index: 14, kind: input, shape index: {}]   ;;  %s3788_s15 = inlined_call_operand.vmem [shape: f32[8,128], index: 15, kind: output, shape index: {}]  }
   0x1   :  { %v2810_v0 = vld [vmem:[%s3773_s1 + $0x8] sm:$0xff]  ;;  %v2809_v1 = vld [vmem:[%s3773_s1] sm:$0xff]  ;;  %v2795_v4 = vld [vmem:[%s3775_s0 + $0x10] sm:$0xff] }
   0x2   :  { %238 = vmatpush.bf16.msra.mxu0 %v2810_v0  ;;  %v2793_v2 = vld [vmem:[%s3775_s0] sm:$0xff]  ;;  %v2794_v3 = vld [vmem:[%s3775_s0 + $0x8] sm:$0xff]  ;;  %v2796_v5 = vld [vmem:[%s3775_s0 + $0x18] sm:$0xff] }
   0x3   :  { %v2797_v6 = vld [vmem:[%s3775_s0 + $0x20] sm:$0xff]  ;;  %v2798_v7 = vld [vmem:[%s3775_s0 + $0x28] sm:$0xff]  ;;  %v2799_v8 = vld [vmem:[%s3775_s0 + $0x30] sm:$0xff] }
   0x4   :  { %v2800_v9 = vld [vmem:[%s3775_s0 + $0x38] sm:$0xff]  ;;  %v3112_v10 = vld [vmem:[%s3774_s2] ss:$0 sm:$0xff]  ;;  %v2802_v20 = vld [vmem:[%s3775_s0 + $0x48] sm:$0xff] }
   0x5   :  { %v2801_v11 = vld [vmem:[%s3775_s0 + $0x40] sm:$0xff]  ;;  %v2803_v29 = vld [vmem:[%s3775_s0 + $0x50] sm:$0xff]  ;;  %v2804_v38 = vld [vmem:[%s3775_s0 + $0x58] sm:$0xff] }
   0x6   :  { %239 = vmatpush.bf16.msra.mxu0 %v2809_v1  ;;  %v2805_v47 = vld [vmem:[%s3775_s0 + $0x60] sm:$0xff]  ;;  %v2806_v56 = vld [vmem:[%s3775_s0 + $0x68] sm:$0xff]  ;;  %v2807_v1 = vld [vmem:[%s3775_s0 + $0x70] sm:$0xff] }
   0x9   :  { %2536 = vmatmul.msk.bf16.vlgmr.msra.gmra.mxu0 %vm183_vm0, %v2793_v2 }
  0x19   :  { %2537 = vmatmul.msk.bf16.gmra.mxu0 %vm183_vm0, %v2794_v3 }
  0x29   :  { %2538 = vmatmul.msk.bf16.gmra.mxu0 %vm183_vm0, %v2795_v4 }
  0x39   :  { %2539 = vmatmul.msk.bf16.gmra.mxu0 %vm183_vm0, %v2796_v5 }
  0x49   :  { %2540 = vmatmul.msk.bf16.gmra.mxu0 %vm183_vm0, %v2797_v6 }
  0x59   :  { %2541 = vmatmul.msk.bf16.gmra.mxu0 %vm183_vm0, %v2798_v7 }
  0x69   :  { %2542 = vmatmul.msk.bf16.gmra.mxu0 %vm183_vm0, %v2799_v8 }
  0x79   :  { %2543 = vmatmul.msk.bf16.gmra.mxu0 %vm183_vm0, %v2800_v9 }
  0x86   :  { %v241_v12 = vpop.f32.mrf.mxu0 }
  0x87   :  { %v242_v13 = vadd.f32 %v3112_v10, %v241_v12 }
  0x89   :  { %v3118_v14 = vmax.f32 %v242_v13, 0.0  ;;  %2544 = vmatmul.msk.bf16.gmra.mxu0 %vm183_vm0, %v2801_v11  ;;  %v2808_v11 = vld [vmem:[%s3775_s0 + $0x78] sm:$0xff] }
  0x8b   :  { %v353_v15 = vmul.f32 %v3118_v14, %v3118_v14 }
  0x8d   :  { %385 = vadd.xlane.f32.xlu0 %v353_v15  ;;  %v2826_v15 = vld [vmem:[%s3776_s3 + $0x78] sm:$0xff] }
  0x8e   :  { %v243_v16 = vpop.f32.mrf.mxu0  ;;  %1025 = vmatpush.bf16.msra.mxu1 %v2826_v15  ;;  %v2819_v15 = vld [vmem:[%s3776_s3 + $0x40] sm:$0xff] }
  0x8f   :  { %v244_v17 = vadd.f32 %v3112_v10, %v243_v16  ;;  %v2818_v16 = vld [vmem:[%s3776_s3 + $0x38] sm:$0xff] }
  0x90   :  { %1122 = vmatpush.bf16.msra.mxu2 %v2818_v16  ;;  %v2811_v16 = vld [vmem:[%s3776_s3] sm:$0xff] }
  0x91   :  { %v3124_v18 = vmax.f32 %v244_v17, 0.0 }
  0x93   :  { %v354_v19 = vmul.f32 %v3124_v18, %v3124_v18 }
  0x95   :  { %387 = vadd.xlane.f32.xlu0 %v354_v19 }
  0x96   :  { %v246_v21 = vpop.f32.mrf.mxu0 }
  0x97   :  { %v247_v22 = vadd.f32 %v3112_v10, %v246_v21  ;;  %v2817_v21 = vld [vmem:[%s3776_s3 + $0x30] sm:$0xff] }
  0x98   :  { %1123 = vmatpush.bf16.msra.mxu2 %v2817_v21 }
  0x99   :  { %v3132_v23 = vmax.f32 %v247_v22, 0.0  ;;  %2545 = vmatmul.msk.bf16.gmra.mxu0 %vm183_vm0, %v2802_v20  ;;  %v2825_v20 = vld [vmem:[%s3776_s3 + $0x70] sm:$0xff] }
  0x9a   :  { %1026 = vmatpush.bf16.msra.mxu1 %v2825_v20 }
  0x9b   :  { %v355_v24 = vmul.f32 %v3132_v23, %v3132_v23 }
  0x9d   :  { %389 = vadd.xlane.f32.xlu1 %v355_v24 }
  0x9e   :  { %v248_v25 = vpop.f32.mrf.mxu0 }
  0x9f   :  { %v249_v26 = vadd.f32 %v3112_v10, %v248_v25 }
  0xa1   :  { %v3138_v27 = vmax.f32 %v249_v26, 0.0  ;;  %v2824_v26 = vld [vmem:[%s3776_s3 + $0x68] sm:$0xff] }
  0xa2   :  { %1027 = vmatpush.bf16.msra.mxu1 %v2824_v26 }
  0xa3   :  { %v356_v28 = vmul.f32 %v3138_v27, %v3138_v27 }
  0xa5   :  { %391 = vadd.xlane.f32.xlu1 %v356_v28  ;;  %v2816_v28 = vld [vmem:[%s3776_s3 + $0x28] sm:$0xff] }
  0xa6   :  { %v251_v30 = vpop.f32.mrf.mxu0  ;;  %1124 = vmatpush.bf16.msra.mxu2 %v2816_v28  ;;  %v2828_v28 = vld [vmem:[%s3776_s3 + $0x88] sm:$0xff] }
  0xa7   :  { %v252_v31 = vadd.f32 %v3112_v10, %v251_v30 }
  0xa9   :  { %v3146_v32 = vmax.f32 %v252_v31, 0.0  ;;  %2546 = vmatmul.msk.bf16.gmra.mxu0 %vm183_vm0, %v2803_v29  ;;  %v2834_v29 = vld [vmem:[%s3776_s3 + $0xb8] sm:$0xff] }
  0xaa   :  { %1275 = vmatpush.bf16.msra.mxu3 %v2834_v29 }
  0xab   :  { %v357_v33 = vmul.f32 %v3146_v32, %v3146_v32 }
  0xad   :  { %393 = vadd.xlane.f32.xlu2 %v357_v33 }
  0xae   :  { %v253_v34 = vpop.f32.mrf.mxu0 }
  0xaf   :  { %v254_v35 = vadd.f32 %v3112_v10, %v253_v34  ;;  %v2823_v34 = vld [vmem:[%s3776_s3 + $0x60] sm:$0xff] }
  0xb0   :  { %1028 = vmatpush.bf16.msra.mxu1 %v2823_v34 }
  0xb1   :  { %v3152_v36 = vmax.f32 %v254_v35, 0.0  ;;  %v2815_v35 = vld [vmem:[%s3776_s3 + $0x20] sm:$0xff] }
  0xb2   :  { %1125 = vmatpush.bf16.msra.mxu2 %v2815_v35 }
  0xb3   :  { %v358_v37 = vmul.f32 %v3152_v36, %v3152_v36 }
  0xb5   :  { %395 = vadd.xlane.f32.xlu2 %v358_v37  ;;  %v2833_v37 = vld [vmem:[%s3776_s3 + $0xb0] sm:$0xff] }
  0xb6   :  { %v256_v39 = vpop.f32.mrf.mxu0  ;;  %1276 = vmatpush.bf16.msra.mxu3 %v2833_v37 }
  0xb7   :  { %v257_v40 = vadd.f32 %v3112_v10, %v256_v39 }
  0xb9   :  { %v3160_v41 = vmax.f32 %v257_v40, 0.0  ;;  %2547 = vmatmul.msk.bf16.gmra.mxu0 %vm183_vm0, %v2804_v38 }
  0xbb   :  { %v359_v42 = vmul.f32 %v3160_v41, %v3160_v41 }
  0xbd   :  { %397 = vadd.xlane.f32.xlu0 %v359_v42  ;;  %v2822_v42 = vld [vmem:[%s3776_s3 + $0x58] sm:$0xff] }
  0xbe   :  { %v258_v43 = vpop.f32.mrf.mxu0  ;;  %1029 = vmatpush.bf16.msra.mxu1 %v2822_v42 }
  0xbf   :  { %v259_v44 = vadd.f32 %v3112_v10, %v258_v43  ;;  %v2814_v43 = vld [vmem:[%s3776_s3 + $0x18] sm:$0xff] }
  0xc0   :  { %1126 = vmatpush.bf16.msra.mxu2 %v2814_v43 }
  0xc1   :  { %v3166_v45 = vmax.f32 %v259_v44, 0.0  ;;  %v2832_v44 = vld [vmem:[%s3776_s3 + $0xa8] sm:$0xff] }
  0xc2   :  { %1277 = vmatpush.bf16.msra.mxu3 %v2832_v44 }
  0xc3   :  { %v360_v46 = vmul.f32 %v3166_v45, %v3166_v45 }
  0xc5   :  { %399 = vadd.xlane.f32.xlu1 %v360_v46 }
  0xc6   :  { %v261_v48 = vpop.f32.mrf.mxu0 }
  0xc7   :  { %v262_v49 = vadd.f32 %v3112_v10, %v261_v48 }
  0xc9   :  { %v3174_v50 = vmax.f32 %v262_v49, 0.0  ;;  %2548 = vmatmul.msk.bf16.gmra.mxu0 %vm183_vm0, %v2805_v47 }
  0xcb   :  { %v361_v51 = vmul.f32 %v3174_v50, %v3174_v50 }
  0xcd   :  { %401 = vadd.xlane.f32.xlu2 %v361_v51 }
  0xce   :  { %v263_v52 = vpop.f32.mrf.mxu0 }
  0xcf   :  { %v264_v53 = vadd.f32 %v3112_v10, %v263_v52 }
  0xd1   :  { %v3180_v54 = vmax.f32 %v264_v53, 0.0  ;;  %v2821_v53 = vld [vmem:[%s3776_s3 + $0x50] sm:$0xff] }
  0xd2   :  { %1030 = vmatpush.bf16.msra.mxu1 %v2821_v53 }
  0xd3   :  { %v362_v55 = vmul.f32 %v3180_v54, %v3180_v54 }
  0xd5   :  { %403 = vadd.xlane.f32.xlu0 %v362_v55  ;;  %v2813_v55 = vld [vmem:[%s3776_s3 + $0x10] sm:$0xff] }
  0xd6   :  { %v266_v57 = vpop.f32.mrf.mxu0  ;;  %1127 = vmatpush.bf16.msra.mxu2 %v2813_v55 }
  0xd7   :  { %v267_v58 = vadd.f32 %v3112_v10, %v266_v57 }
  0xd9   :  { %v3188_v59 = vmax.f32 %v267_v58, 0.0  ;;  %2549 = vmatmul.msk.bf16.gmra.mxu0 %vm183_vm0, %v2806_v56  ;;  %v2831_v56 = vld [vmem:[%s3776_s3 + $0xa0] sm:$0xff] }
  0xda   :  { %1278 = vmatpush.bf16.msra.mxu3 %v2831_v56 }
  0xdb   :  { %v363_v60 = vmul.f32 %v3188_v59, %v3188_v59 }
  0xdd   :  { %405 = vadd.xlane.f32.xlu1 %v363_v60 }
  0xde   :  { %v268_v61 = vpop.f32.mrf.mxu0 }
  0xdf   :  { %v269_v62 = vadd.f32 %v3112_v10, %v268_v61 }
  0xe1   :  { %v3194_v63 = vmax.f32 %v269_v62, 0.0 }
  0xe3   :  { %v364_v0 = vmul.f32 %v3194_v63, %v3194_v63 }
  0xe5   :  { %407 = vadd.xlane.f32.xlu2 %v364_v0  ;;  %v2820_v0 = vld [vmem:[%s3776_s3 + $0x48] sm:$0xff] }
  0xe6   :  { %v271_v2 = vpop.f32.mrf.mxu0  ;;  %1031 = vmatpush.bf16.msra.mxu1 %v2820_v0 }
  0xe7   :  { %v272_v3 = vadd.f32 %v3112_v10, %v271_v2  ;;  %v2830_v2 = vld [vmem:[%s3776_s3 + $0x98] sm:$0xff] }
  0xe8   :  { %1279 = vmatpush.bf16.msra.mxu3 %v2830_v2 }
  0xe9   :  { %v3202_v4 = vmax.f32 %v272_v3, 0.0  ;;  %2550 = vmatmul.msk.bf16.gmra.mxu0 %vm183_vm0, %v2807_v1  ;;  %v2812_v1 = vld [vmem:[%s3776_s3 + $0x8] sm:$0xff] }
  0xea   :  { %1128 = vmatpush.bf16.msra.mxu2 %v2812_v1  ;;  %1032 = vmatpush.bf16.msra.mxu1 %v2819_v15 }
  0xeb   :  { %v365_v5 = vmul.f32 %v3202_v4, %v3202_v4 }
  0xed   :  { %409 = vadd.xlane.f32.xlu0 %v365_v5 }
  0xee   :  { %v273_v6 = vpop.f32.mrf.mxu0  ;;  %1129 = vmatpush.bf16.msra.mxu2 %v2811_v16 }
  0xef   :  { %v274_v7 = vadd.f32 %v3112_v10, %v273_v6 }
  0xf1   :  { %v3208_v8 = vmax.f32 %v274_v7, 0.0 }
  0xf3   :  { %v366_v9 = vmul.f32 %v3208_v8, %v3208_v8 }
  0xf5   :  { %411 = vadd.xlane.f32.xlu1 %v366_v9 }
  0xf6   :  { %v276_v12 = vpop.f32.mrf.mxu0 }
  0xf7   :  { %v277_v13 = vadd.f32 %v3112_v10, %v276_v12 }
  0xf9   :  { %v3222_v17 = vmax.f32 %v277_v13, 0.0  ;;  %2551 = vmatmul.msk.bf16.gmra.mxu0 %vm183_vm0, %v2808_v11 }
  0xfb   :  { %v367_v19 = vmul.f32 %v3222_v17, %v3222_v17 }
  0xfd   :  { %413 = vadd.xlane.f32.xlu2 %v367_v19  ;;  %v2829_v19 = vld [vmem:[%s3776_s3 + $0x90] sm:$0xff] }
  0xfe   :  { %v278_v22 = vpop.f32.mrf.mxu0  ;;  %1280 = vmatpush.bf16.msra.mxu3 %v2829_v19 }
  0xff   :  { %v279_v24 = vadd.f32 %v3112_v10, %v278_v22 }
 0x100   :  { %v386_v25 = vpop.xlane.xlu0 %385 }
 0x101   :  { %v3243_v30 = vmax.f32 %v279_v24, 0.0  ;;  %v449_v31 = vmax.f32 %v386_v25, 1e-24 }
 0x102   :  { %1281 = vmatpush.bf16.msra.mxu3 %v2828_v28 }
 0x103   :  { %2874 = vrsqrt.f32 %v449_v31  ;;  %v368_v33 = vmul.f32 %v3243_v30, %v3243_v30  ;;  %vm487_vm2 = vweird.f32 %v449_v31 }
 0x105   :  { %415 = vadd.xlane.f32.xlu0 %v368_v33 }
 0x106   :  { %v281_v38 = vpop.f32.mrf.mxu0 }
 0x107   :  { %v282_v39 = vadd.f32 %v3112_v10, %v281_v38 }
 0x108   :  { %v388_v40 = vpop.xlane.xlu0 %387 }
 0x109   :  { %v2875_v46 = vpop.eup %2874  ;;  %v3266_v47 = vmax.f32 %v282_v39, 0.0  ;;  %v450_v48 = vmax.f32 %v388_v40, 1e-24  ;;  %v2827_v39 = vld [vmem:[%s3776_s3 + $0x80] sm:$0xff] }
 0x10a   :  { %v482_v49 = vmul.f32 %v2875_v46, %v449_v31  ;;  %vm488_vm1 = vweird.f32 %v2875_v46  ;;  %1282 = vmatpush.bf16.msra.mxu3 %v2827_v39 }
 0x10b   :  { %2876 = vrsqrt.f32 %v450_v48  ;;  %v369_v51 = vmul.f32 %v3266_v47, %v3266_v47  ;;  %vm489_vm3 = vmor %vm487_vm2, %vm488_vm1  ;;  %vm497_vm5 = vweird.f32 %v450_v48 }
 0x10c   :  { %v483_v52 = vmul.f32 %v2875_v46, %v482_v49 }
 0x10d   :  { %417 = vadd.xlane.f32.xlu1 %v369_v51 }
 0x10e   :  { %v484_v57 = vmul.f32 0.5, %v483_v52  ;;  %v283_v58 = vpop.f32.mrf.mxu0 }
 0x10f   :  { %v284_v60 = vadd.f32 %v3112_v10, %v283_v58 }
 0x110   :  { %v485_v61 = vsub.f32 1.5, %v484_v57  ;;  %v390_v62 = vpop.xlane.xlu1 %389 }
 0x111   :  { %v2877_v3 = vpop.eup %2876  ;;  %v3289_v5 = vmax.f32 %v284_v60, 0.0  ;;  %v451_v6 = vmax.f32 %v390_v62, 1e-24 }
 0x112   :  { %v486_v7 = vmul.f32 %v2875_v46, %v485_v61  ;;  %v492_v9 = vmul.f32 %v2877_v3, %v450_v48  ;;  %vm498_vm4 = vweird.f32 %v2877_v3 }
 0x113   :  { %2878 = vrsqrt.f32 %v451_v6  ;;  %v370_v11 = vmul.f32 %v3289_v5, %v3289_v5  ;;  %vm499_vm6 = vmor %vm497_vm5, %vm498_vm4  ;;  %vm507_vm8 = vweird.f32 %v451_v6 }
 0x114   :  { %v490_v12 = vsel %vm489_vm3, %v2875_v46, %v486_v7  ;;  %v493_v13 = vmul.f32 %v2877_v3, %v492_v9 }
 0x115   :  { %v801_v20 = vmul.f32 %v490_v12, %v3118_v14  ;;  %419 = vadd.xlane.f32.xlu2 %v370_v11 }
 0x116   :  { %v494_v21 = vmul.f32 0.5, %v493_v13  ;;  %v286_v22 = vpop.f32.mrf.mxu0 }
 0x117   :  { %833 = vst [vmem:[#allocation2] sm:$0xff] %v801_v20  ;;  %v287_v24 = vadd.f32 %v3112_v10, %v286_v22 }
 0x118   :  { %v495_v25 = vsub.f32 1.5, %v494_v21  ;;  %v392_v26 = vpop.xlane.xlu1 %391 }
 0x119   :  { %v2879_v29 = vpop.eup %2878  ;;  %v3307_v31 = vmax.f32 %v287_v24, 0.0  ;;  %v452_v14 = vmax.f32 %v392_v26, 1e-24 }
 0x11a   :  { %v496_v33 = vmul.f32 %v2877_v3, %v495_v25  ;;  %v502_v34 = vmul.f32 %v2879_v29, %v451_v6  ;;  %vm508_vm7 = vweird.f32 %v2879_v29 }
 0x11b   :  { %2880 = vrsqrt.f32 %v452_v14  ;;  %v371_v35 = vmul.f32 %v3307_v31, %v3307_v31  ;;  %vm509_vm9 = vmor %vm507_vm8, %vm508_vm7  ;;  %vm517_vm11 = vweird.f32 %v452_v14 }
 0x11c   :  { %v500_v37 = vsel %vm499_vm6, %v2877_v3, %v496_v33  ;;  %v503_v38 = vmul.f32 %v2879_v29, %v502_v34 }
 0x11d   :  { %v802_v40 = vmul.f32 %v500_v37, %v3124_v18  ;;  %421 = vadd.xlane.f32.xlu0 %v371_v35 }
 0x11e   :  { %v504_v42 = vmul.f32 0.5, %v503_v38  ;;  %v288_v43 = vpop.f32.mrf.mxu0 }
 0x11f   :  { %834 = vst [vmem:[#allocation2 + $0x8] sm:$0xff] %v802_v40  ;;  %v289_v44 = vadd.f32 %v3112_v10, %v288_v43 }
 0x120   :  { %v505_v46 = vsub.f32 1.5, %v504_v42  ;;  %v394_v48 = vpop.xlane.xlu2 %393 }
 0x121   :  { %v2881_v49 = vpop.eup %2880  ;;  %v3316_v51 = vmax.f32 %v289_v44, 0.0  ;;  %v453_v52 = vmax.f32 %v394_v48, 1e-24 }
 0x122   :  { %v506_v53 = vmul.f32 %v2879_v29, %v505_v46  ;;  %v512_v55 = vmul.f32 %v2881_v49, %v452_v14  ;;  %vm518_vm10 = vweird.f32 %v2881_v49 }
 0x123   :  { %2882 = vrsqrt.f32 %v453_v52  ;;  %v372_v18 = vmul.f32 %v3316_v51, %v3316_v51  ;;  %vm519_vm12 = vmor %vm517_vm11, %vm518_vm10  ;;  %vm527_vm14 = vweird.f32 %v453_v52 }
 0x124   :  { %v510_v56 = vsel %vm509_vm9, %v2879_v29, %v506_v53  ;;  %v513_v57 = vmul.f32 %v2881_v49, %v512_v55 }
 0x125   :  { %v803_v58 = vmul.f32 %v510_v56, %v3132_v23  ;;  %423 = vadd.xlane.f32.xlu1 %v372_v18 }
 0x126   :  { %v514_v60 = vmul.f32 0.5, %v513_v57  ;;  %v291_v61 = vpop.f32.mrf.mxu0  ;;  %v922_v34 = vld [vmem:[#allocation2 + $0x1] ss:$2 sm:$0xff]  ;;  %v866_v35 = vld [vmem:[#allocation2] ss:$2 sm:$0xff] }
 0x127   :  { %835 = vst [vmem:[#allocation2 + $0x10] sm:$0xff] %v803_v58  ;;  %v292_v62 = vadd.f32 %v3112_v10, %v291_v61 }
 0x128   :  { %v515_v0 = vsub.f32 1.5, %v514_v60  ;;  %v396_v1 = vpop.xlane.xlu2 %395 }
 0x129   :  { %v2883_v2 = vpop.eup %2882  ;;  %v3322_v3 = vmax.f32 %v292_v62, 0.0  ;;  %v454_v6 = vmax.f32 %v396_v1, 1e-24 }
 0x12a   :  { %v516_v7 = vmul.f32 %v2881_v49, %v515_v0  ;;  %v522_v9 = vmul.f32 %v2883_v2, %v453_v52  ;;  %vm528_vm13 = vweird.f32 %v2883_v2 }
 0x12b   :  { %2884 = vrsqrt.f32 %v454_v6  ;;  %v373_v23 = vmul.f32 %v3322_v3, %v3322_v3  ;;  %vm529_vm15 = vmor %vm527_vm14, %vm528_vm13  ;;  %vm537_vm2 = vweird.f32 %v454_v6 }
 0x12c   :  { %v520_v11 = vsel %vm519_vm12, %v2881_v49, %v516_v7  ;;  %v523_v12 = vmul.f32 %v2883_v2, %v522_v9 }
 0x12d   :  { %v804_v13 = vmul.f32 %v520_v11, %v3138_v27  ;;  %425 = vadd.xlane.f32.xlu2 %v373_v23 }
 0x12e   :  { %v524_v15 = vmul.f32 0.5, %v523_v12  ;;  %v293_v16 = vpop.f32.mrf.mxu0  ;;  %v1172_v62 = vld [vmem:[#allocation2 + $0x2] ss:$2 sm:$0xff] }
 0x12f   :  { %836 = vst [vmem:[#allocation2 + $0x18] sm:$0xff] %v804_v13  ;;  %v294_v19 = vadd.f32 %v3112_v10, %v293_v16 }
 0x130   :  { %v525_v20 = vsub.f32 1.5, %v524_v15  ;;  %v398_v21 = vpop.xlane.xlu0 %397 }
 0x131   :  { %v2885_v22 = vpop.eup %2884  ;;  %v3328_v24 = vmax.f32 %v294_v19, 0.0  ;;  %v455_v25 = vmax.f32 %v398_v21, 1e-24 }
 0x132   :  { %v526_v26 = vmul.f32 %v2883_v2, %v525_v20  ;;  %v532_v28 = vmul.f32 %v2885_v22, %v454_v6  ;;  %vm538_vm1 = vweird.f32 %v2885_v22 }
 0x133   :  { %2886 = vrsqrt.f32 %v455_v25  ;;  %v374_v27 = vmul.f32 %v3328_v24, %v3328_v24  ;;  %vm539_vm3 = vmor %vm537_vm2, %vm538_vm1  ;;  %vm547_vm5 = vweird.f32 %v455_v25 }
 0x134   :  { %v530_v29 = vsel %vm529_vm15, %v2883_v2, %v526_v26  ;;  %v533_v14 = vmul.f32 %v2885_v22, %v532_v28 }
 0x135   :  { %v805_v33 = vmul.f32 %v530_v29, %v3146_v32  ;;  %427 = vadd.xlane.f32.xlu0 %v374_v27 }
 0x136   :  { %v534_v37 = vmul.f32 0.5, %v533_v14  ;;  %v296_v38 = vpop.f32.mrf.mxu0  ;;  %v924_v39 = vld [vmem:[#allocation2 + $0x11] ss:$2 sm:$0xff]  ;;  %v868_v40 = vld [vmem:[#allocation2 + $0x10] ss:$2 sm:$0xff] }
 0x137   :  { %837 = vst [vmem:[#allocation2 + $0x20] sm:$0xff] %v805_v33  ;;  %v297_v42 = vadd.f32 %v3112_v10, %v296_v38  ;;  %v953_v43 = vpack.c.bf16 %v924_v39, %v922_v34  ;;  %v897_v44 = vpack.c.bf16 %v868_v40, %v866_v35 }
 0x138   :  { %v535_v46 = vsub.f32 1.5, %v534_v37  ;;  %v400_v48 = vpop.xlane.xlu1 %399 }
 0x139   :  { %v2887_v49 = vpop.eup %2886  ;;  %v3334_v52 = vmax.f32 %v297_v42, 0.0  ;;  %v456_v53 = vmax.f32 %v400_v48, 1e-24  ;;  %1033 = vmatmul.bf16.vlgmr.msra.gmra.mxu1 %v953_v43  ;;  %1130 = vmatmul.bf16.vlgmr.msra.gmra.mxu2 %v897_v44 }
 0x13a   :  { %v536_v32 = vmul.f32 %v2885_v22, %v535_v46  ;;  %v542_v55 = vmul.f32 %v2887_v49, %v455_v25  ;;  %vm548_vm4 = vweird.f32 %v2887_v49 }
 0x13b   :  { %2888 = vrsqrt.f32 %v456_v53  ;;  %v375_v18 = vmul.f32 %v3334_v52, %v3334_v52  ;;  %vm549_vm6 = vmor %vm547_vm5, %vm548_vm4  ;;  %vm557_vm8 = vweird.f32 %v456_v53 }
 0x13c   :  { %v540_v56 = vsel %vm539_vm3, %v2885_v22, %v536_v32  ;;  %v543_v57 = vmul.f32 %v2887_v49, %v542_v55 }
 0x13d   :  { %v806_v58 = vmul.f32 %v540_v56, %v3152_v36  ;;  %429 = vadd.xlane.f32.xlu1 %v375_v18 }
 0x13e   :  { %v544_v60 = vmul.f32 0.5, %v543_v57  ;;  %v298_v61 = vpop.f32.mrf.mxu0  ;;  %v1174_v0 = vld [vmem:[#allocation2 + $0x12] ss:$2 sm:$0xff] }
 0x13f   :  { %838 = vst [vmem:[#allocation2 + $0x28] sm:$0xff] %v806_v58  ;;  %v299_v1 = vadd.f32 %v3112_v10, %v298_v61  ;;  %v1203_v2 = vpack.c.bf16 %v1174_v0, %v1172_v62 }
 0x140   :  { %v545_v6 = vsub.f32 1.5, %v544_v60  ;;  %v402_v7 = vpop.xlane.xlu2 %401 }
 0x141   :  { %v2889_v9 = vpop.eup %2888  ;;  %v3340_v23 = vmax.f32 %v299_v1, 0.0  ;;  %v457_v11 = vmax.f32 %v402_v7, 1e-24  ;;  %1283 = vmatmul.bf16.vlgmr.msra.gmra.mxu3 %v1203_v2 }
 0x142   :  { %v546_v12 = vmul.f32 %v2887_v49, %v545_v6  ;;  %v552_v36 = vmul.f32 %v2889_v9, %v456_v53  ;;  %vm558_vm7 = vweird.f32 %v2889_v9 }
 0x143   :  { %2890 = vrsqrt.f32 %v457_v11  ;;  %v376_v13 = vmul.f32 %v3340_v23, %v3340_v23  ;;  %vm559_vm9 = vmor %vm557_vm8, %vm558_vm7  ;;  %vm567_vm11 = vweird.f32 %v457_v11 }
 0x144   :  { %v550_v15 = vsel %vm549_vm6, %v2887_v49, %v546_v12  ;;  %v553_v16 = vmul.f32 %v2889_v9, %v552_v36 }
 0x145   :  { %v807_v19 = vmul.f32 %v550_v15, %v3160_v41  ;;  %431 = vadd.xlane.f32.xlu2 %v376_v13 }
 0x146   :  { %v554_v20 = vmul.f32 0.5, %v553_v16  ;;  %v301_v21 = vpop.f32.mrf.mxu0  ;;  %v926_v56 = vld [vmem:[#allocation2 + $0x21] ss:$2 sm:$0xff]  ;;  %v870_v57 = vld [vmem:[#allocation2 + $0x20] ss:$2 sm:$0xff] }
 0x147   :  { %839 = vst [vmem:[#allocation2 + $0x30] sm:$0xff] %v807_v19  ;;  %v302_v22 = vadd.f32 %v3112_v10, %v301_v21 }
 0x148   :  { %v555_v26 = vsub.f32 1.5, %v554_v20  ;;  %v404_v28 = vpop.xlane.xlu0 %403 }
 0x149   :  { %v2891_v25 = vpop.eup %2890  ;;  %v3346_v27 = vmax.f32 %v302_v22, 0.0  ;;  %v458_v29 = vmax.f32 %v404_v28, 1e-24 }
 0x14a   :  { %v556_v14 = vmul.f32 %v2889_v9, %v555_v26  ;;  %v562_v33 = vmul.f32 %v2891_v25, %v457_v11  ;;  %vm568_vm10 = vweird.f32 %v2891_v25 }
 0x14b   :  { %2892 = vrsqrt.f32 %v458_v29  ;;  %v377_v41 = vmul.f32 %v3346_v27, %v3346_v27  ;;  %vm569_vm12 = vmor %vm567_vm11, %vm568_vm10  ;;  %vm577_vm14 = vweird.f32 %v458_v29 }
 0x14c   :  { %v560_v34 = vsel %vm559_vm9, %v2889_v9, %v556_v14  ;;  %v563_v35 = vmul.f32 %v2891_v25, %v562_v33 }
 0x14d   :  { %v808_v37 = vmul.f32 %v560_v34, %v3166_v45  ;;  %433 = vadd.xlane.f32.xlu0 %v377_v41 }
 0x14e   :  { %v564_v38 = vmul.f32 0.5, %v563_v35  ;;  %v303_v39 = vpop.f32.mrf.mxu0  ;;  %v1176_v22 = vld [vmem:[#allocation2 + $0x22] ss:$2 sm:$0xff] }
 0x14f   :  { %840 = vst [vmem:[#allocation2 + $0x38] sm:$0xff] %v808_v37  ;;  %v304_v40 = vadd.f32 %v3112_v10, %v303_v39 }
 0x150   :  { %v565_v42 = vsub.f32 1.5, %v564_v38  ;;  %v406_v43 = vpop.xlane.xlu1 %405 }
 0x151   :  { %v2893_v44 = vpop.eup %2892  ;;  %v3352_v46 = vmax.f32 %v304_v40, 0.0  ;;  %v459_v48 = vmax.f32 %v406_v43, 1e-24 }
 0x152   :  { %v566_v49 = vmul.f32 %v2891_v25, %v565_v42  ;;  %v572_v53 = vmul.f32 %v2893_v44, %v458_v29  ;;  %vm578_vm13 = vweird.f32 %v2893_v44 }
 0x153   :  { %2894 = vrsqrt.f32 %v459_v48  ;;  %v378_v45 = vmul.f32 %v3352_v46, %v3352_v46  ;;  %vm579_vm15 = vmor %vm577_vm14, %vm578_vm13  ;;  %vm587_vm2 = vweird.f32 %v459_v48 }
 0x154   :  { %v570_v32 = vsel %vm569_vm12, %v2891_v25, %v566_v49  ;;  %v573_v55 = vmul.f32 %v2893_v44, %v572_v53 }
 0x155   :  { %v809_v18 = vmul.f32 %v570_v32, %v3174_v50  ;;  %435 = vadd.xlane.f32.xlu1 %v378_v45 }
 0x156   :  { %v574_v58 = vmul.f32 0.5, %v573_v55  ;;  %v306_v60 = vpop.f32.mrf.mxu0  ;;  %v928_v61 = vld [vmem:[#allocation2 + $0x31] ss:$2 sm:$0xff]  ;;  %v872_v62 = vld [vmem:[#allocation2 + $0x30] ss:$2 sm:$0xff] }
 0x157   :  { %841 = vst [vmem:[#allocation2 + $0x40] sm:$0xff] %v809_v18  ;;  %v307_v0 = vadd.f32 %v3112_v10, %v306_v60  ;;  %v954_v1 = vpack.c.bf16 %v928_v61, %v926_v56  ;;  %v898_v2 = vpack.c.bf16 %v872_v62, %v870_v57 }
 0x158   :  { %v575_v6 = vsub.f32 1.5, %v574_v58  ;;  %v408_v7 = vpop.xlane.xlu2 %407 }
 0x159   :  { %v2895_v9 = vpop.eup %2894  ;;  %v3358_v11 = vmax.f32 %v307_v0, 0.0  ;;  %v460_v12 = vmax.f32 %v408_v7, 1e-24  ;;  %1038 = vmatmul.bf16.gmra.mxu1 %v954_v1  ;;  %1135 = vmatmul.bf16.gmra.mxu2 %v898_v2 }
 0x15a   :  { %v576_v50 = vmul.f32 %v2893_v44, %v575_v6  ;;  %v582_v36 = vmul.f32 %v2895_v9, %v459_v48  ;;  %vm588_vm1 = vweird.f32 %v2895_v9 }
 0x15b   :  { %2896 = vrsqrt.f32 %v460_v12  ;;  %v379_v13 = vmul.f32 %v3358_v11, %v3358_v11  ;;  %vm589_vm3 = vmor %vm587_vm2, %vm588_vm1  ;;  %vm597_vm5 = vweird.f32 %v460_v12 }
 0x15c   :  { %v580_v15 = vsel %vm579_vm15, %v2893_v44, %v576_v50  ;;  %v583_v16 = vmul.f32 %v2895_v9, %v582_v36 }
 0x15d   :  { %v810_v19 = vmul.f32 %v580_v15, %v3180_v54  ;;  %437 = vadd.xlane.f32.xlu2 %v379_v13 }
 0x15e   :  { %v584_v20 = vmul.f32 0.5, %v583_v16  ;;  %v308_v21 = vpop.f32.mrf.mxu0  ;;  %v1178_v26 = vld [vmem:[#allocation2 + $0x32] ss:$2 sm:$0xff] }
 0x15f   :  { %842 = vst [vmem:[#allocation2 + $0x48] sm:$0xff] %v810_v19  ;;  %v309_v28 = vadd.f32 %v3112_v10, %v308_v21  ;;  %v1204_v25 = vpack.c.bf16 %v1178_v26, %v1176_v22 }
 0x160   :  { %v585_v29 = vsub.f32 1.5, %v584_v20  ;;  %v410_v14 = vpop.xlane.xlu0 %409 }
 0x161   :  { %v2897_v33 = vpop.eup %2896  ;;  %v3364_v41 = vmax.f32 %v309_v28, 0.0  ;;  %v461_v34 = vmax.f32 %v410_v14, 1e-24  ;;  %1288 = vmatmul.bf16.gmra.mxu3 %v1204_v25 }
 0x162   :  { %v586_v35 = vmul.f32 %v2895_v9, %v585_v29  ;;  %v592_v54 = vmul.f32 %v2897_v33, %v460_v12  ;;  %vm598_vm4 = vweird.f32 %v2897_v33 }
 0x163   :  { %2898 = vrsqrt.f32 %v461_v34  ;;  %v380_v37 = vmul.f32 %v3364_v41, %v3364_v41  ;;  %vm599_vm6 = vmor %vm597_vm5, %vm598_vm4  ;;  %vm607_vm8 = vweird.f32 %v461_v34 }
 0x164   :  { %v590_v38 = vsel %vm589_vm3, %v2895_v9, %v586_v35  ;;  %v593_v39 = vmul.f32 %v2897_v33, %v592_v54 }
 0x165   :  { %v811_v40 = vmul.f32 %v590_v38, %v3188_v59  ;;  %439 = vadd.xlane.f32.xlu0 %v380_v37 }
 0x166   :  { %v594_v42 = vmul.f32 0.5, %v593_v39  ;;  %v311_v43 = vpop.f32.mrf.mxu0  ;;  %v930_v15 = vld [vmem:[#allocation2 + $0x41] ss:$2 sm:$0xff]  ;;  %v874_v16 = vld [vmem:[#allocation2 + $0x40] ss:$2 sm:$0xff] }
 0x167   :  { %843 = vst [vmem:[#allocation2 + $0x50] sm:$0xff] %v811_v40  ;;  %v312_v44 = vadd.f32 %v3112_v10, %v311_v43 }
 0x168   :  { %v595_v49 = vsub.f32 1.5, %v594_v42  ;;  %v412_v53 = vpop.xlane.xlu1 %411 }
 0x169   :  { %v2899_v48 = vpop.eup %2898  ;;  %v3370_v45 = vmax.f32 %v312_v44, 0.0  ;;  %v462_v32 = vmax.f32 %v412_v53, 1e-24 }
 0x16a   :  { %v596_v55 = vmul.f32 %v2897_v33, %v595_v49  ;;  %v602_v18 = vmul.f32 %v2899_v48, %v461_v34  ;;  %vm608_vm7 = vweird.f32 %v2899_v48 }
 0x16b   :  { %2900 = vrsqrt.f32 %v462_v32  ;;  %v381_v59 = vmul.f32 %v3370_v45, %v3370_v45  ;;  %vm609_vm9 = vmor %vm607_vm8, %vm608_vm7  ;;  %vm617_vm11 = vweird.f32 %v462_v32 }
 0x16c   :  { %v600_v56 = vsel %vm599_vm6, %v2897_v33, %v596_v55  ;;  %v603_v57 = vmul.f32 %v2899_v48, %v602_v18 }
 0x16d   :  { %v812_v58 = vmul.f32 %v600_v56, %v3194_v63  ;;  %441 = vadd.xlane.f32.xlu1 %v381_v59 }
 0x16e   :  { %v604_v60 = vmul.f32 0.5, %v603_v57  ;;  %v313_v61 = vpop.f32.mrf.mxu0  ;;  %v1180_v44 = vld [vmem:[#allocation2 + $0x42] ss:$2 sm:$0xff] }
 0x16f   :  { %844 = vst [vmem:[#allocation2 + $0x58] sm:$0xff] %v812_v58  ;;  %v314_v62 = vadd.f32 %v3112_v10, %v313_v61 }
 0x170   :  { %v605_v0 = vsub.f32 1.5, %v604_v60  ;;  %v414_v1 = vpop.xlane.xlu2 %413 }
 0x171   :  { %v2901_v2 = vpop.eup %2900  ;;  %v3376_v6 = vmax.f32 %v314_v62, 0.0  ;;  %v463_v7 = vmax.f32 %v414_v1, 1e-24 }
 0x172   :  { %v606_v9 = vmul.f32 %v2899_v48, %v605_v0  ;;  %v612_v12 = vmul.f32 %v2901_v2, %v462_v32  ;;  %vm618_vm10 = vweird.f32 %v2901_v2 }
 0x173   :  { %2902 = vrsqrt.f32 %v463_v7  ;;  %v382_v63 = vmul.f32 %v3376_v6, %v3376_v6  ;;  %vm619_vm12 = vmor %vm617_vm11, %vm618_vm10  ;;  %vm627_vm14 = vweird.f32 %v463_v7 }
 0x174   :  { %v610_v50 = vsel %vm609_vm9, %v2899_v48, %v606_v9  ;;  %v613_v36 = vmul.f32 %v2901_v2, %v612_v12 }
 0x175   :  { %v813_v13 = vmul.f32 %v610_v50, %v3202_v4  ;;  %443 = vadd.xlane.f32.xlu2 %v382_v63 }
 0x176   :  { %v614_v19 = vmul.f32 0.5, %v613_v36  ;;  %v316_v20 = vpop.f32.mrf.mxu0  ;;  %v932_v21 = vld [vmem:[#allocation2 + $0x51] ss:$2 sm:$0xff]  ;;  %v876_v22 = vld [vmem:[#allocation2 + $0x50] ss:$2 sm:$0xff] }
 0x177   :  { %845 = vst [vmem:[#allocation2 + $0x60] sm:$0xff] %v813_v13  ;;  %v317_v26 = vadd.f32 %v3112_v10, %v316_v20  ;;  %v955_v28 = vpack.c.bf16 %v932_v21, %v930_v15  ;;  %v899_v25 = vpack.c.bf16 %v876_v22, %v874_v16 }
 0x178   :  { %v615_v29 = vsub.f32 1.5, %v614_v19  ;;  %v416_v14 = vpop.xlane.xlu0 %415 }
 0x179   :  { %v2903_v33 = vpop.eup %2902  ;;  %v3382_v34 = vmax.f32 %v317_v26, 0.0  ;;  %v464_v35 = vmax.f32 %v416_v14, 1e-24  ;;  %1043 = vmatmul.bf16.gmra.mxu1 %v955_v28  ;;  %1140 = vmatmul.bf16.gmra.mxu2 %v899_v25 }
 0x17a   :  { %v616_v4 = vmul.f32 %v2901_v2, %v615_v29  ;;  %v622_v54 = vmul.f32 %v2903_v33, %v463_v7  ;;  %vm628_vm13 = vweird.f32 %v2903_v33 }
 0x17b   :  { %2904 = vrsqrt.f32 %v464_v35  ;;  %v383_v37 = vmul.f32 %v3382_v34, %v3382_v34  ;;  %vm629_vm15 = vmor %vm627_vm14, %vm628_vm13  ;;  %vm637_vm2 = vweird.f32 %v464_v35 }
 0x17c   :  { %v620_v38 = vsel %vm619_vm12, %v2901_v2, %v616_v4  ;;  %v623_v39 = vmul.f32 %v2903_v33, %v622_v54 }
 0x17d   :  { %v814_v40 = vmul.f32 %v620_v38, %v3208_v8  ;;  %445 = vadd.xlane.f32.xlu0 %v383_v37 }
 0x17e   :  { %v624_v42 = vmul.f32 0.5, %v623_v39  ;;  %v318_v43 = vpop.f32.mrf.mxu0  ;;  %v1182_v49 = vld [vmem:[#allocation2 + $0x52] ss:$2 sm:$0xff] }
 0x17f   :  { %846 = vst [vmem:[#allocation2 + $0x68] sm:$0xff] %v814_v40  ;;  %v319_v53 = vadd.f32 %v3112_v10, %v318_v43  ;;  %v1205_v48 = vpack.c.bf16 %v1182_v49, %v1180_v44 }
 0x180   :  { %v625_v32 = vsub.f32 1.5, %v624_v42  ;;  %v418_v55 = vpop.xlane.xlu1 %417 }
 0x181   :  { %v2905_v18 = vpop.eup %2904  ;;  %v3388_v59 = vmax.f32 %v319_v53, 0.0  ;;  %v465_v56 = vmax.f32 %v418_v55, 1e-24  ;;  %1293 = vmatmul.bf16.gmra.mxu3 %v1205_v48  ;;  %v2842_v55 = vld [vmem:[%s3776_s3 + $0xf8] sm:$0xff] }
 0x182   :  { %v626_v57 = vmul.f32 %v2903_v33, %v625_v32  ;;  %v632_v8 = vmul.f32 %v2905_v18, %v464_v35  ;;  %vm638_vm1 = vweird.f32 %v2905_v18  ;;  %1444 = vmatpush.bf16.msrb.mxu1 %v2842_v55 }
 0x183   :  { %2906 = vrsqrt.f32 %v465_v56  ;;  %v384_v58 = vmul.f32 %v3388_v59, %v3388_v59  ;;  %vm639_vm3 = vmor %vm637_vm2, %vm638_vm1  ;;  %vm647_vm5 = vweird.f32 %v465_v56 }
 0x184   :  { %v630_v60 = vsel %vm629_vm15, %v2903_v33, %v626_v57  ;;  %v633_v61 = vmul.f32 %v2905_v18, %v632_v8 }
 0x185   :  { %v815_v10 = vmul.f32 %v630_v60, %v3222_v17  ;;  %447 = vadd.xlane.f32.xlu1 %v384_v58 }
 0x186   :  { %v634_v62 = vmul.f32 0.5, %v633_v61  ;;  %v934_v25 = vld [vmem:[#allocation2 + $0x61] ss:$2 sm:$0xff]  ;;  %v878_v29 = vld [vmem:[#allocation2 + $0x60] ss:$2 sm:$0xff] }
 0x187   :  { %847 = vst [vmem:[#allocation2 + $0x70] sm:$0xff] %v815_v10 }
 0x188   :  { %v635_v0 = vsub.f32 1.5, %v634_v62  ;;  %v420_v1 = vpop.xlane.xlu2 %419 }
 0x189   :  { %v2907_v2 = vpop.eup %2906  ;;  %v466_v9 = vmax.f32 %v420_v1, 1e-24 }
 0x18a   :  { %v636_v12 = vmul.f32 %v2905_v18, %v635_v0  ;;  %v642_v7 = vmul.f32 %v2907_v2, %v465_v56  ;;  %vm648_vm4 = vweird.f32 %v2907_v2 }
 0x18b   :  { %2908 = vrsqrt.f32 %v466_v9  ;;  %vm649_vm6 = vmor %vm647_vm5, %vm648_vm4  ;;  %vm657_vm8 = vweird.f32 %v466_v9 }
 0x18c   :  { %v640_v63 = vsel %vm639_vm3, %v2905_v18, %v636_v12  ;;  %v643_v50 = vmul.f32 %v2907_v2, %v642_v7 }
 0x18d   :  { %v816_v36 = vmul.f32 %v640_v63, %v3243_v30 }
 0x18e   :  { %v644_v13 = vmul.f32 0.5, %v643_v50  ;;  %v1184_v53 = vld [vmem:[#allocation2 + $0x62] ss:$2 sm:$0xff] }
 0x18f   :  { %848 = vst [vmem:[#allocation2 + $0x78] sm:$0xff] %v816_v36 }
 0x190   :  { %v645_v17 = vsub.f32 1.5, %v644_v13  ;;  %v422_v15 = vpop.xlane.xlu0 %421 }
 0x191   :  { %v2909_v16 = vpop.eup %2908  ;;  %v467_v19 = vmax.f32 %v422_v15, 1e-24 }
 0x192   :  { %v646_v20 = vmul.f32 %v2907_v2, %v645_v17  ;;  %v652_v21 = vmul.f32 %v2909_v16, %v466_v9  ;;  %vm658_vm7 = vweird.f32 %v2909_v16 }
 0x193   :  { %2910 = vrsqrt.f32 %v467_v19  ;;  %vm659_vm9 = vmor %vm657_vm8, %vm658_vm7  ;;  %vm667_vm11 = vweird.f32 %v467_v19 }
 0x194   :  { %v650_v22 = vsel %vm649_vm6, %v2907_v2, %v646_v20  ;;  %v653_v26 = vmul.f32 %v2909_v16, %v652_v21 }
 0x195   :  { %v817_v28 = vmul.f32 %v650_v22, %v3266_v47 }
 0x196   :  { %v654_v14 = vmul.f32 0.5, %v653_v26  ;;  %v936_v30 = vld [vmem:[#allocation2 + $0x71] ss:$2 sm:$0xff]  ;;  %v880_v33 = vld [vmem:[#allocation2 + $0x70] ss:$2 sm:$0xff] }
 0x197   :  { %849 = vst [vmem:[#allocation2 + $0x80] sm:$0xff] %v817_v28  ;;  %v956_v35 = vpack.c.bf16 %v936_v30, %v934_v25  ;;  %v900_v4 = vpack.c.bf16 %v880_v33, %v878_v29 }
 0x198   :  { %v655_v54 = vsub.f32 1.5, %v654_v14  ;;  %v424_v37 = vpop.xlane.xlu1 %423 }
 0x199   :  { %v2911_v38 = vpop.eup %2910  ;;  %v468_v39 = vmax.f32 %v424_v37, 1e-24  ;;  %1048 = vmatmul.bf16.gmra.mxu1 %v956_v35  ;;  %1145 = vmatmul.bf16.gmra.mxu2 %v900_v4 }
 0x19a   :  { %v656_v40 = vmul.f32 %v2909_v16, %v655_v54  ;;  %v662_v42 = vmul.f32 %v2911_v38, %v467_v19  ;;  %vm668_vm10 = vweird.f32 %v2911_v38 }
 0x19b   :  { %2912 = vrsqrt.f32 %v468_v39  ;;  %vm669_vm12 = vmor %vm667_vm11, %vm668_vm10  ;;  %vm677_vm14 = vweird.f32 %v468_v39 }
 0x19c   :  { %v660_v47 = vsel %vm659_vm9, %v2909_v16, %v656_v40  ;;  %v663_v43 = vmul.f32 %v2911_v38, %v662_v42 }
 0x19d   :  { %v818_v44 = vmul.f32 %v660_v47, %v3289_v5 }
 0x19e   :  { %v664_v49 = vmul.f32 0.5, %v663_v43  ;;  %v1186_v48 = vld [vmem:[#allocation2 + $0x72] ss:$2 sm:$0xff] }
 0x19f   :  { %850 = vst [vmem:[#allocation2 + $0x88] sm:$0xff] %v818_v44  ;;  %v1206_v32 = vpack.c.bf16 %v1186_v48, %v1184_v53  ;;  %v2840_v48 = vld [vmem:[%s3776_s3 + $0xe8] sm:$0xff] }
 0x1a0   :  { %v665_v18 = vsub.f32 1.5, %v664_v49  ;;  %v426_v56 = vpop.xlane.xlu2 %425 }
 0x1a1   :  { %v2913_v57 = vpop.eup %2912  ;;  %v469_v8 = vmax.f32 %v426_v56, 1e-24  ;;  %1298 = vmatmul.bf16.gmra.mxu3 %v1206_v32 }
 0x1a2   :  { %v666_v58 = vmul.f32 %v2911_v38, %v665_v18  ;;  %v672_v60 = vmul.f32 %v2913_v57, %v468_v39  ;;  %vm678_vm13 = vweird.f32 %v2913_v57 }
 0x1a3   :  { %2914 = vrsqrt.f32 %v469_v8  ;;  %vm679_vm15 = vmor %vm677_vm14, %vm678_vm13  ;;  %vm687_vm2 = vweird.f32 %v469_v8 }
 0x1a4   :  { %v670_v5 = vsel %vm669_vm12, %v2911_v38, %v666_v58  ;;  %v673_v61 = vmul.f32 %v2913_v57, %v672_v60 }
 0x1a5   :  { %v819_v10 = vmul.f32 %v670_v5, %v3307_v31  ;;  %v2841_v31 = vld [vmem:[%s3776_s3 + $0xf0] sm:$0xff] }
 0x1a6   :  { %v674_v62 = vmul.f32 0.5, %v673_v61  ;;  %1445 = vmatpush.bf16.msrb.mxu1 %v2841_v31  ;;  %v938_v28 = vld [vmem:[#allocation2 + $0x81] ss:$2 sm:$0xff]  ;;  %v882_v25 = vld [vmem:[#allocation2 + $0x80] ss:$2 sm:$0xff] }
 0x1a7   :  { %851 = vst [vmem:[#allocation2 + $0x90] sm:$0xff] %v819_v10 }
 0x1a8   :  { %v675_v0 = vsub.f32 1.5, %v674_v62  ;;  %v428_v1 = vpop.xlane.xlu0 %427 }
 0x1a9   :  { %v2915_v2 = vpop.eup %2914  ;;  %v470_v9 = vmax.f32 %v428_v1, 1e-24 }
 0x1aa   :  { %v676_v12 = vmul.f32 %v2913_v57, %v675_v0  ;;  %v682_v7 = vmul.f32 %v2915_v2, %v469_v8  ;;  %vm688_vm1 = vweird.f32 %v2915_v2  ;;  %1446 = vmatpush.bf16.msrb.mxu1 %v2840_v48 }
 0x1ab   :  { %2916 = vrsqrt.f32 %v470_v9  ;;  %vm689_vm3 = vmor %vm687_vm2, %vm688_vm1  ;;  %vm697_vm5 = vweird.f32 %v470_v9 }
 0x1ac   :  { %v680_v63 = vsel %vm679_vm15, %v2913_v57, %v676_v12  ;;  %v683_v50 = vmul.f32 %v2915_v2, %v682_v7 }
 0x1ad   :  { %v820_v36 = vmul.f32 %v680_v63, %v3316_v51 }
 0x1ae   :  { %v684_v13 = vmul.f32 0.5, %v683_v50  ;;  %v1188_v44 = vld [vmem:[#allocation2 + $0x82] ss:$2 sm:$0xff] }
 0x1af   :  { %852 = vst [vmem:[#allocation2 + $0x98] sm:$0xff] %v820_v36 }
 0x1b0   :  { %v685_v17 = vsub.f32 1.5, %v684_v13  ;;  %v430_v15 = vpop.xlane.xlu1 %429 }
 0x1b1   :  { %v2917_v16 = vpop.eup %2916  ;;  %v471_v19 = vmax.f32 %v430_v15, 1e-24 }
 0x1b2   :  { %v686_v20 = vmul.f32 %v2915_v2, %v685_v17  ;;  %v692_v21 = vmul.f32 %v2917_v16, %v470_v9  ;;  %vm698_vm4 = vweird.f32 %v2917_v16 }
 0x1b3   :  { %2918 = vrsqrt.f32 %v471_v19  ;;  %vm699_vm6 = vmor %vm697_vm5, %vm698_vm4  ;;  %vm707_vm8 = vweird.f32 %v471_v19 }
 0x1b4   :  { %v690_v22 = vsel %vm689_vm3, %v2915_v2, %v686_v20  ;;  %v693_v26 = vmul.f32 %v2917_v16, %v692_v21 }
 0x1b5   :  { %v821_v51 = vmul.f32 %v690_v22, %v3322_v3 }
 0x1b6   :  { %v694_v29 = vmul.f32 0.5, %v693_v26  ;;  %v940_v14 = vld [vmem:[#allocation2 + $0x91] ss:$2 sm:$0xff]  ;;  %v884_v30 = vld [vmem:[#allocation2 + $0x90] ss:$2 sm:$0xff] }
 0x1b7   :  { %853 = vst [vmem:[#allocation2 + $0xa0] sm:$0xff] %v821_v51  ;;  %v957_v33 = vpack.c.bf16 %v940_v14, %v938_v28  ;;  %v901_v35 = vpack.c.bf16 %v884_v30, %v882_v25 }
 0x1b8   :  { %v695_v4 = vsub.f32 1.5, %v694_v29  ;;  %v432_v54 = vpop.xlane.xlu2 %431 }
 0x1b9   :  { %v2919_v37 = vpop.eup %2918  ;;  %v472_v38 = vmax.f32 %v432_v54, 1e-24  ;;  %1053 = vmatmul.bf16.gmra.mxu1 %v957_v33  ;;  %1150 = vmatmul.bf16.gmra.mxu2 %v901_v35 }
 0x1ba   :  { %v696_v39 = vmul.f32 %v2917_v16, %v695_v4  ;;  %v702_v40 = vmul.f32 %v2919_v37, %v471_v19  ;;  %vm708_vm7 = vweird.f32 %v2919_v37 }
 0x1bb   :  { %2920 = vrsqrt.f32 %v472_v38  ;;  %vm709_vm9 = vmor %vm707_vm8, %vm708_vm7  ;;  %vm717_vm11 = vweird.f32 %v472_v38 }
 0x1bc   :  { %v700_v3 = vsel %vm699_vm6, %v2917_v16, %v696_v39  ;;  %v703_v42 = vmul.f32 %v2919_v37, %v702_v40 }
 0x1bd   :  { %v822_v47 = vmul.f32 %v700_v3, %v3328_v24 }
 0x1be   :  { %v704_v43 = vmul.f32 0.5, %v703_v42  ;;  %v1190_v49 = vld [vmem:[#allocation2 + $0x92] ss:$2 sm:$0xff] }
 0x1bf   :  { %854 = vst [vmem:[#allocation2 + $0xa8] sm:$0xff] %v822_v47  ;;  %v1207_v53 = vpack.c.bf16 %v1190_v49, %v1188_v44  ;;  %v2838_v42 = vld [vmem:[%s3776_s3 + $0xd8] sm:$0xff] }
 0x1c0   :  { %v705_v32 = vsub.f32 1.5, %v704_v43  ;;  %v434_v55 = vpop.xlane.xlu0 %433 }
 0x1c1   :  { %v2921_v18 = vpop.eup %2920  ;;  %v473_v56 = vmax.f32 %v434_v55, 1e-24  ;;  %1303 = vmatmul.bf16.gmra.mxu3 %v1207_v53 }
 0x1c2   :  { %v706_v57 = vmul.f32 %v2919_v37, %v705_v32  ;;  %v712_v8 = vmul.f32 %v2921_v18, %v472_v38  ;;  %vm718_vm10 = vweird.f32 %v2921_v18 }
 0x1c3   :  { %2922 = vrsqrt.f32 %v473_v56  ;;  %vm719_vm12 = vmor %vm717_vm11, %vm718_vm10  ;;  %vm727_vm14 = vweird.f32 %v473_v56 }
 0x1c4   :  { %v710_v24 = vsel %vm709_vm9, %v2919_v37, %v706_v57  ;;  %v713_v58 = vmul.f32 %v2921_v18, %v712_v8 }
 0x1c5   :  { %v823_v60 = vmul.f32 %v710_v24, %v3334_v52  ;;  %v2839_v52 = vld [vmem:[%s3776_s3 + $0xe0] sm:$0xff] }
 0x1c6   :  { %v714_v5 = vmul.f32 0.5, %v713_v58  ;;  %1447 = vmatpush.bf16.msrb.mxu1 %v2839_v52  ;;  %v942_v20 = vld [vmem:[#allocation2 + $0xa1] ss:$2 sm:$0xff]  ;;  %v886_v21 = vld [vmem:[#allocation2 + $0xa0] ss:$2 sm:$0xff] }
 0x1c7   :  { %855 = vst [vmem:[#allocation2 + $0xb0] sm:$0xff] %v823_v60 }
 0x1c8   :  { %v715_v61 = vsub.f32 1.5, %v714_v5  ;;  %v436_v10 = vpop.xlane.xlu1 %435 }
 0x1c9   :  { %v2923_v62 = vpop.eup %2922  ;;  %v474_v0 = vmax.f32 %v436_v10, 1e-24 }
 0x1ca   :  { %v716_v1 = vmul.f32 %v2921_v18, %v715_v61  ;;  %v722_v2 = vmul.f32 %v2923_v62, %v473_v56  ;;  %vm728_vm13 = vweird.f32 %v2923_v62  ;;  %1448 = vmatpush.bf16.msrb.mxu1 %v2838_v42 }
 0x1cb   :  { %2924 = vrsqrt.f32 %v474_v0  ;;  %vm729_vm15 = vmor %vm727_vm14, %vm728_vm13  ;;  %vm737_vm2 = vweird.f32 %v474_v0 }
 0x1cc   :  { %v720_v9 = vsel %vm719_vm12, %v2921_v18, %v716_v1  ;;  %v723_v12 = vmul.f32 %v2923_v62, %v722_v2  ;;  %v2990_v2 = vmov 0.0  }
 0x1cd   :  { %v824_v7 = vmul.f32 %v720_v9, %v3340_v23  ;;  %865 = vst [vmem:[#allocation2 + $0x100] sm:$0xff] %v2990_v2  ;;  %v1349_v2 = vld [vmem:[#allocation2 + $0x43] ss:$2 sm:$0xff] }
 0x1ce   :  { %v724_v63 = vmul.f32 0.5, %v723_v12  ;;  %v1192_v39 = vld [vmem:[#allocation2 + $0xa2] ss:$2 sm:$0xff] }
 0x1cf   :  { %856 = vst [vmem:[#allocation2 + $0xb8] sm:$0xff] %v824_v7  ;;  %v2836_v7 = vld [vmem:[%s3776_s3 + $0xc8] sm:$0xff] }
 0x1d0   :  { %v725_v50 = vsub.f32 1.5, %v724_v63  ;;  %v438_v36 = vpop.xlane.xlu2 %437 }
 0x1d1   :  { %v2925_v13 = vpop.eup %2924  ;;  %v475_v31 = vmax.f32 %v438_v36, 1e-24 }
 0x1d2   :  { %v726_v17 = vmul.f32 %v2923_v62, %v725_v50  ;;  %v732_v15 = vmul.f32 %v2925_v13, %v474_v0  ;;  %vm738_vm1 = vweird.f32 %v2925_v13 }
 0x1d3   :  { %2926 = vrsqrt.f32 %v475_v31  ;;  %vm739_vm3 = vmor %vm737_vm2, %vm738_vm1  ;;  %vm747_vm5 = vweird.f32 %v475_v31 }
 0x1d4   :  { %v730_v16 = vsel %vm729_vm15, %v2923_v62, %v726_v17  ;;  %v733_v19 = vmul.f32 %v2925_v13, %v732_v15 }
 0x1d5   :  { %v825_v23 = vmul.f32 %v730_v16, %v3346_v27 }
 0x1d6   :  { %v734_v22 = vmul.f32 0.5, %v733_v19  ;;  %v944_v26 = vld [vmem:[#allocation2 + $0xb1] ss:$2 sm:$0xff]  ;;  %v888_v51 = vld [vmem:[#allocation2 + $0xb0] ss:$2 sm:$0xff] }
 0x1d7   :  { %857 = vst [vmem:[#allocation2 + $0xc0] sm:$0xff] %v825_v23  ;;  %v958_v28 = vpack.c.bf16 %v944_v26, %v942_v20  ;;  %v902_v25 = vpack.c.bf16 %v888_v51, %v886_v21 }
 0x1d8   :  { %v735_v29 = vsub.f32 1.5, %v734_v22  ;;  %v440_v14 = vpop.xlane.xlu0 %439 }
 0x1d9   :  { %v2927_v30 = vpop.eup %2926  ;;  %v476_v33 = vmax.f32 %v440_v14, 1e-24  ;;  %1058 = vmatmul.bf16.gmra.mxu1 %v958_v28  ;;  %1155 = vmatmul.bf16.gmra.mxu2 %v902_v25 }
 0x1da   :  { %v736_v35 = vmul.f32 %v2925_v13, %v735_v29  ;;  %v742_v4 = vmul.f32 %v2927_v30, %v475_v31  ;;  %vm748_vm4 = vweird.f32 %v2927_v30 }
 0x1db   :  { %2928 = vrsqrt.f32 %v476_v33  ;;  %vm749_vm6 = vmor %vm747_vm5, %vm748_vm4  ;;  %vm757_vm8 = vweird.f32 %v476_v33 }
 0x1dc   :  { %v740_v27 = vsel %vm739_vm3, %v2925_v13, %v736_v35  ;;  %v743_v54 = vmul.f32 %v2927_v30, %v742_v4 }
 0x1dd   :  { %v826_v37 = vmul.f32 %v740_v27, %v3352_v46 }
 0x1de   :  { %v744_v38 = vmul.f32 0.5, %v743_v54  ;;  %v1194_v40 = vld [vmem:[#allocation2 + $0xb2] ss:$2 sm:$0xff] }
 0x1df   :  { %858 = vst [vmem:[#allocation2 + $0xc8] sm:$0xff] %v826_v37  ;;  %v1208_v3 = vpack.c.bf16 %v1194_v40, %v1192_v39 }
 0x1e0   :  { %v745_v47 = vsub.f32 1.5, %v744_v38  ;;  %v442_v43 = vpop.xlane.xlu1 %441 }
 0x1e1   :  { %v2929_v44 = vpop.eup %2928  ;;  %v477_v49 = vmax.f32 %v442_v43, 1e-24  ;;  %1308 = vmatmul.bf16.gmra.mxu3 %v1208_v3 }
 0x1e2   :  { %v746_v53 = vmul.f32 %v2927_v30, %v745_v47  ;;  %v752_v48 = vmul.f32 %v2929_v44, %v476_v33  ;;  %vm758_vm7 = vweird.f32 %v2929_v44 }
 0x1e3   :  { %2930 = vrsqrt.f32 %v477_v49  ;;  %vm759_vm9 = vmor %vm757_vm8, %vm758_vm7  ;;  %vm767_vm11 = vweird.f32 %v477_v49  ;;  %vm1561_vm7 = vcmask 523264  }
 0x1e4   :  { %v750_v46 = vsel %vm749_vm6, %v2927_v30, %v746_v53  ;;  %v753_v32 = vmul.f32 %v2929_v44, %v752_v48 }
 0x1e5   :  { %v827_v55 = vmul.f32 %v750_v46, %v3358_v11  ;;  %v2837_v11 = vld [vmem:[%s3776_s3 + $0xd0] sm:$0xff] }
 0x1e6   :  { %v754_v18 = vmul.f32 0.5, %v753_v32  ;;  %1449 = vmatpush.bf16.msrb.mxu1 %v2837_v11  ;;  %v946_v13 = vld [vmem:[#allocation2 + $0xc1] ss:$2 sm:$0xff]  ;;  %v890_v31 = vld [vmem:[#allocation2 + $0xc0] ss:$2 sm:$0xff] }
 0x1e7   :  { %859 = vst [vmem:[#allocation2 + $0xd0] sm:$0xff] %v827_v55 }
 0x1e8   :  { %v755_v56 = vsub.f32 1.5, %v754_v18  ;;  %v444_v57 = vpop.xlane.xlu2 %443 }
 0x1e9   :  { %v2931_v8 = vpop.eup %2930  ;;  %v478_v24 = vmax.f32 %v444_v57, 1e-24  ;;  %v1034_v57 = vpop.f32.mrf.mxu1 }
 0x1ea   :  { %v756_v58 = vmul.f32 %v2929_v44, %v755_v56  ;;  %v762_v60 = vmul.f32 %v2931_v8, %v477_v49  ;;  %vm768_vm10 = vweird.f32 %v2931_v8  ;;  %1450 = vmatpush.bf16.msrb.mxu1 %v2836_v7  ;;  %v1355_v7 = vld [vmem:[#allocation2 + $0x73] ss:$2 sm:$0xff] }
 0x1eb   :  { %2932 = vrsqrt.f32 %v478_v24  ;;  %vm769_vm12 = vmor %vm767_vm11, %vm768_vm10  ;;  %vm777_vm14 = vweird.f32 %v478_v24 }
 0x1ec   :  { %v760_v5 = vsel %vm759_vm9, %v2929_v44, %v756_v58  ;;  %v763_v61 = vmul.f32 %v2931_v8, %v762_v60  ;;  %v1341_v58 = vld [vmem:[#allocation2 + $0x3] ss:$2 sm:$0xff] }
 0x1ed   :  { %v828_v10 = vmul.f32 %v760_v5, %v3364_v41 }
 0x1ee   :  { %v764_v62 = vmul.f32 0.5, %v763_v61  ;;  %v1196_v33 = vld [vmem:[#allocation2 + $0xc2] ss:$2 sm:$0xff]  ;;  %v1347_v61 = vld [vmem:[#allocation2 + $0x33] ss:$2 sm:$0xff] }
 0x1ef   :  { %860 = vst [vmem:[#allocation2 + $0xd8] sm:$0xff] %v828_v10  ;;  %v1345_v10 = vld [vmem:[#allocation2 + $0x23] ss:$2 sm:$0xff] }
 0x1f0   :  { %v765_v0 = vsub.f32 1.5, %v764_v62  ;;  %v446_v1 = vpop.xlane.xlu0 %445  ;;  %v1373_v62 = vpack.c.bf16 %v1347_v61, %v1345_v10 }
 0x1f1   :  { %v2933_v9 = vpop.eup %2932  ;;  %v479_v12 = vmax.f32 %v446_v1, 1e-24 }
 0x1f2   :  { %v766_v63 = vmul.f32 %v2931_v8, %v765_v0  ;;  %v772_v41 = vmul.f32 %v2933_v9, %v478_v24  ;;  %vm778_vm13 = vweird.f32 %v2933_v9  ;;  %v1343_v24 = vld [vmem:[#allocation2 + $0x13] ss:$2 sm:$0xff] }
 0x1f3   :  { %2934 = vrsqrt.f32 %v479_v12  ;;  %vm779_vm15 = vmor %vm777_vm14, %vm778_vm13  ;;  %vm787_vm2 = vweird.f32 %v479_v12  ;;  %v1372_v60 = vpack.c.bf16 %v1343_v24, %v1341_v58  ;;  %v1351_v0 = vld [vmem:[#allocation2 + $0x53] ss:$2 sm:$0xff] }
 0x1f4   :  { %v770_v52 = vsel %vm769_vm12, %v2931_v8, %v766_v63  ;;  %v773_v50 = vmul.f32 %v2933_v9, %v772_v41  ;;  %v1036_v8 = vpop.f32.mrf.mxu1  ;;  %v1353_v63 = vld [vmem:[#allocation2 + $0x63] ss:$2 sm:$0xff] }
 0x1f5   :  { %v829_v36 = vmul.f32 %v770_v52, %v3370_v45  ;;  %v2835_v45 = vld [vmem:[%s3776_s3 + $0xc0] sm:$0xff]  ;;  %v1375_v41 = vpack.c.bf16 %v1355_v7, %v1353_v63 }
 0x1f6   :  { %v774_v17 = vmul.f32 0.5, %v773_v50  ;;  %v948_v15 = vld [vmem:[#allocation2 + $0xd1] ss:$2 sm:$0xff]  ;;  %v892_v16 = vld [vmem:[#allocation2 + $0xd0] ss:$2 sm:$0xff]  ;;  %1451 = vmatpush.bf16.msrb.mxu1 %v2835_v45 }
 0x1f7   :  { %861 = vst [vmem:[#allocation2 + $0xe0] sm:$0xff] %v829_v36  ;;  %v959_v19 = vpack.c.bf16 %v948_v15, %v946_v13  ;;  %v903_v23 = vpack.c.bf16 %v892_v16, %v890_v31  ;;  %v1359_v36 = vld [vmem:[#allocation2 + $0x93] ss:$2 sm:$0xff]  ;;  %v1357_v13 = vld [vmem:[#allocation2 + $0x83] ss:$2 sm:$0xff] }
 0x1f8   :  { %v775_v20 = vsub.f32 1.5, %v774_v17  ;;  %v448_v21 = vpop.xlane.xlu1 %447  ;;  %v1376_v31 = vpack.c.bf16 %v1359_v36, %v1357_v13  ;;  %v1363_v16 = vld [vmem:[#allocation2 + $0xb3] ss:$2 sm:$0xff] }
 0x1f9   :  { %v2935_v22 = vpop.eup %2934  ;;  %v480_v26 = vmax.f32 %v448_v21, 1e-24  ;;  %1063 = vmatmul.bf16.gmra.mxu1 %v959_v19  ;;  %1160 = vmatmul.bf16.gmra.mxu2 %v903_v23  ;;  %v1361_v19 = vld [vmem:[#allocation2 + $0xa3] ss:$2 sm:$0xff] }
 0x1fa   :  { %v776_v51 = vmul.f32 %v2933_v9, %v775_v20  ;;  %v782_v28 = vmul.f32 %v2935_v22, %v479_v12  ;;  %vm788_vm1 = vweird.f32 %v2935_v22  ;;  %v1377_v23 = vpack.c.bf16 %v1363_v16, %v1361_v19 }
 0x1fb   :  { %2936 = vrsqrt.f32 %v480_v26  ;;  %vm789_vm3 = vmor %vm787_vm2, %vm788_vm1  ;;  %vm797_vm5 = vweird.f32 %v480_v26 }
 0x1fc   :  { %v780_v25 = vsel %vm779_vm15, %v2933_v9, %v776_v51  ;;  %v783_v29 = vmul.f32 %v2935_v22, %v782_v28  ;;  %v1374_v9 = vpack.c.bf16 %v1351_v0, %v1349_v2  ;;  %v1131_v28 = vpop.f32.mrf.mxu2 }
 0x1fd   :  { %v830_v14 = vmul.f32 %v780_v25, %v3376_v6  ;;  %v1284_v25 = vpop.f32.mrf.mxu3 }
 0x1fe   :  { %v784_v30 = vmul.f32 0.5, %v783_v29  ;;  %v1198_v35 = vld [vmem:[#allocation2 + $0xd2] ss:$2 sm:$0xff] }
 0x1ff   :  { %862 = vst [vmem:[#allocation2 + $0xe8] sm:$0xff] %v830_v14  ;;  %v1209_v4 = vpack.c.bf16 %v1198_v35, %v1196_v33 }
 0x200   :  { %v785_v27 = vsub.f32 1.5, %v784_v30 }
 0x201   :  { %v2937_v54 = vpop.eup %2936  ;;  %1313 = vmatmul.bf16.gmra.mxu3 %v1209_v4 }
 0x202   :  { %v786_v37 = vmul.f32 %v2935_v22, %v785_v27  ;;  %v792_v38 = vmul.f32 %v2937_v54, %v480_v26  ;;  %vm798_vm4 = vweird.f32 %v2937_v54  ;;  %v1365_v26 = vld [vmem:[#allocation2 + $0xc3] ss:$2 sm:$0xff] }
 0x203   :  { %vm799_vm6 = vmor %vm797_vm5, %vm798_vm4 }
 0x204   :  { %v790_v39 = vsel %vm789_vm3, %v2935_v22, %v786_v37  ;;  %v793_v40 = vmul.f32 %v2937_v54, %v792_v38  ;;  %v1367_v22 = vld [vmem:[#allocation2 + $0xd3] ss:$2 sm:$0xff]  ;;  %v1133_v35 = vpop.f32.mrf.mxu2  ;;  %v1132_v37 = vadd.f32 %v1131_v28, %v1034_v57 }
 0x205   :  { %v831_v3 = vmul.f32 %v790_v39, %v3382_v34  ;;  %v1378_v51 = vpack.c.bf16 %v1367_v22, %v1365_v26  ;;  %v1286_v4 = vpop.f32.mrf.mxu3  ;;  %v3465_v39 = vld [vmem:[%s3777_s4] ss:$0 sm:$0xff] }
 0x206   :  { %v794_v42 = vmul.f32 0.5, %v793_v40  ;;  %v950_v49 = vld [vmem:[#allocation2 + $0xe1] ss:$2 sm:$0xff]  ;;  %v894_v53 = vld [vmem:[#allocation2 + $0xe0] ss:$2 sm:$0xff]  ;;  %v1324_v38 = vadd.f32 %v1284_v25, %v1132_v37 }
 0x207   :  { %863 = vst [vmem:[#allocation2 + $0xf0] sm:$0xff] %v831_v3 }
 0x208   :  { %v795_v6 = vsub.f32 1.5, %v794_v42 }
 0x20a   :  { %v796_v47 = vmul.f32 %v2937_v54, %v795_v6 }
 0x20c   :  { %v800_v43 = vsel %vm799_vm6, %v2937_v54, %v796_v47  ;;  %v1136_v54 = vpop.f32.mrf.mxu2 }
 0x20d   :  { %v832_v44 = vmul.f32 %v800_v43, %v3388_v59  ;;  %v3434_v59 = vpop.f32.mrf.mxu1  ;;  %v1289_v40 = vpop.f32.mrf.mxu3  ;;  %v1134_v43 = vadd.f32 %v1133_v35, %v1036_v8 }
 0x20e   :  { %v1200_v48 = vld [vmem:[#allocation2 + $0xe2] ss:$2 sm:$0xff]  ;;  %v1369_v30 = vld [vmem:[#allocation2 + $0xe3] ss:$2 sm:$0xff] }
 0x20f   :  { %864 = vst [vmem:[#allocation2 + $0xf8] sm:$0xff] %v832_v44 }
 0x214   :  { %v1138_v47 = vpop.f32.mrf.mxu2 }
 0x215   :  { %v3436_v5 = vpop.f32.mrf.mxu1 }
 0x216   :  { %v952_v46 = vld [vmem:[#allocation2 + $0xf1] ss:$2 sm:$0xff]  ;;  %v896_v32 = vld [vmem:[#allocation2 + $0xf0] ss:$2 sm:$0xff]  ;;  %v1139_v0 = vadd.f32 %v1138_v47, %v3436_v5 }
 0x217   :  { %v1202_v55 = vld [vmem:[#allocation2 + $0xf2] ss:$2 sm:$0xff]  ;;  %v960_v18 = vpack.c.bf16 %v952_v46, %v950_v49  ;;  %v904_v56 = vpack.c.bf16 %v896_v32, %v894_v53  ;;  %v1371_v29 = vld [vmem:[#allocation2 + $0xf3] ss:$2 sm:$0xff]  ;;  %v1325_v49 = vadd.f32 %v1286_v4, %v1134_v43 }
 0x218   :  { %v1210_v34 = vpack.c.bf16 %v1202_v55, %v1200_v48  ;;  %v1379_v33 = vpack.c.bf16 %v1371_v29, %v1369_v30  ;;  %v1291_v55 = vpop.f32.mrf.mxu3 }
 0x219   :  { %1068 = vmatmul.bf16.gmra.mxu1 %v960_v18  ;;  %1165 = vmatmul.bf16.gmra.mxu2 %v904_v56 }
 0x21a   :  { %1318 = vmatmul.bf16.gmra.mxu3 %v1210_v34  ;;  %v1137_v34 = vadd.f32 %v1136_v54, %v3434_v59  ;;  %v1327_v59 = vadd.f32 %v1291_v55, %v1139_v0 }
 0x21c   :  { %v1141_v56 = vpop.f32.mrf.mxu2  ;;  %v1326_v8 = vadd.f32 %v1289_v40, %v1137_v34 }
 0x21d   :  { %v3438_v11 = vpop.f32.mrf.mxu1 }
 0x21e   :  { %v1142_v16 = vadd.f32 %v1141_v56, %v3438_v11 }
 0x220   :  { %v1294_v10 = vpop.f32.mrf.mxu3 }
 0x225   :  { %v3440_v1 = vpop.f32.mrf.mxu1 }
 0x229   :  { %1452 = vmatmul.bf16.vlgmr.msrb.gmra.mxu1 %v1372_v60 }
 0x22d   :  { %v3442_v12 = vpop.f32.mrf.mxu1 }
 0x235   :  { %v3444_v52 = vpop.f32.mrf.mxu1 }
 0x239   :  { %1457 = vmatmul.bf16.gmra.mxu1 %v1373_v62 }
 0x23d   :  { %v3446_v50 = vpop.f32.mrf.mxu1 }
 0x245   :  { %v3448_v17 = vpop.f32.mrf.mxu1 }
 0x249   :  { %1462 = vmatmul.bf16.gmra.mxu1 %v1374_v9  ;;  %v1143_v9 = vpop.f32.mrf.mxu2 }
 0x24a   :  { %v1144_v30 = vadd.f32 %v1143_v9, %v3440_v1 }
 0x251   :  { %v1146_v5 = vpop.f32.mrf.mxu2 }
 0x256   :  { %v3450_v15 = vpop.f32.mrf.mxu1 }
 0x259   :  { %1467 = vmatmul.bf16.gmra.mxu1 %v1375_v41  ;;  %v1148_v4 = vpop.f32.mrf.mxu2 }
 0x25e   :  { %v3452_v20 = vpop.f32.mrf.mxu1 }
 0x261   :  { %v1151_v43 = vpop.f32.mrf.mxu2 }
 0x269   :  { %1472 = vmatmul.bf16.gmra.mxu1 %v1376_v31  ;;  %v1296_v31 = vpop.f32.mrf.mxu3 }
 0x26a   :  { %v1329_v11 = vadd.f32 %v1296_v31, %v1144_v30  ;;  %v2846_v31 = vld [vmem:[%s3778_s5 + $0x18] sm:$0xff] }
 0x26b   :  { %1978 = vmatpush.bf16.msrb.mxu3 %v2846_v31 }
 0x271   :  { %v1299_v29 = vpop.f32.mrf.mxu3 }
 0x276   :  { %v3454_v21 = vpop.f32.mrf.mxu1 }
 0x279   :  { %1477 = vmatmul.bf16.gmra.mxu1 %v1377_v23  ;;  %v1328_v23 = vadd.f32 %v1294_v10, %v1142_v16 }
 0x27e   :  { %v3456_v45 = vpop.f32.mrf.mxu1 }
 0x289   :  { %1482 = vmatmul.bf16.gmra.mxu1 %v1378_v51 }
 0x296   :  { %v3458_v14 = vpop.f32.mrf.mxu1 }
 0x299   :  { %1487 = vmatmul.bf16.gmra.mxu1 %v1379_v33 }
 0x29e   :  { %v3460_v27 = vpop.f32.mrf.mxu1 }
 0x2a6   :  { %v1453_v3 = vpop.f32.mrf.mxu1 }
 0x2a7   :  { %v1493_v42 = vadd.f32 %v1453_v3, %v1324_v38  ;;  %v1147_v3 = vadd.f32 %v1146_v5, %v3442_v12 }
 0x2a9   :  { %v1513_v6 = vadd.f32 %v3465_v39, %v1493_v42  ;;  %v1330_v1 = vadd.f32 %v1299_v29, %v1147_v3 }
 0x2ab   :  { %v3468_v44 = vmax.f32 %v1513_v6, 0.0  ;;  %v1301_v6 = vpop.f32.mrf.mxu3 }
 0x2ad   :  { %v1545_v53 = vmul.f32 %v3468_v44, %v3468_v44 }
 0x2ae   :  { %v1455_v48 = vpop.f32.mrf.mxu1 }
 0x2af   :  { %v1494_v46 = vadd.f32 %v1455_v48, %v1325_v49  ;;  %v1562_v32 = vsel %vm1561_vm7, %v1545_v53, 0.0 }
 0x2b0   :  { %1563 = vadd.xlane.f32.xlu2 %v1562_v32  ;;  %v1149_v32 = vadd.f32 %v1148_v4, %v3444_v52 }
 0x2b1   :  { %v1514_v18 = vadd.f32 %v3465_v39, %v1494_v46 }
 0x2b3   :  { %v3475_v57 = vmax.f32 %v1514_v18, 0.0  ;;  %v1304_v12 = vpop.f32.mrf.mxu3  ;;  %v1331_v18 = vadd.f32 %v1301_v6, %v1149_v32 }
 0x2b5   :  { %v1546_v24 = vmul.f32 %v3475_v57, %v3475_v57 }
 0x2b6   :  { %v1458_v58 = vpop.f32.mrf.mxu1 }
 0x2b7   :  { %v1495_v60 = vadd.f32 %v1458_v58, %v1326_v8  ;;  %v1565_v61 = vsel %vm1561_vm7, %v1546_v24, 0.0  ;;  %v1153_v58 = vpop.f32.mrf.mxu2 }
 0x2b8   :  { %1566 = vadd.xlane.f32.xlu0 %v1565_v61  ;;  %v1152_v61 = vadd.f32 %v1151_v43, %v3446_v50  ;;  %v2850_v50 = vld [vmem:[%s3778_s5 + $0x38] sm:$0xff] }
 0x2b9   :  { %v1515_v62 = vadd.f32 %v3465_v39, %v1495_v60  ;;  %1913 = vmatpush.bf16.msrb.mxu2 %v2850_v50 }
 0x2ba   :  { %v1332_v52 = vadd.f32 %v1304_v12, %v1152_v61 }
 0x2bb   :  { %v3482_v2 = vmax.f32 %v1515_v62, 0.0  ;;  %v1306_v0 = vpop.f32.mrf.mxu3 }
 0x2bd   :  { %v1547_v7 = vmul.f32 %v3482_v2, %v3482_v2 }
 0x2be   :  { %v1460_v63 = vpop.f32.mrf.mxu1 }
 0x2bf   :  { %v1496_v41 = vadd.f32 %v1460_v63, %v1327_v59  ;;  %v1568_v36 = vsel %vm1561_vm7, %v1547_v7, 0.0  ;;  %v1156_v63 = vpop.f32.mrf.mxu2 }
 0x2c0   :  { %1569 = vadd.xlane.f32.xlu1 %v1568_v36  ;;  %v1154_v36 = vadd.f32 %v1153_v58, %v3448_v17 }
 0x2c1   :  { %v1516_v13 = vadd.f32 %v3465_v39, %v1496_v41 }
 0x2c2   :  { %v1333_v16 = vadd.f32 %v1306_v0, %v1154_v36 }
 0x2c3   :  { %v3489_v19 = vmax.f32 %v1516_v13, 0.0 }
 0x2c5   :  { %v1548_v22 = vmul.f32 %v3489_v19, %v3489_v19 }
 0x2c6   :  { %v1463_v26 = vpop.f32.mrf.mxu1 }
 0x2c7   :  { %v1497_v51 = vadd.f32 %v1463_v26, %v1328_v23  ;;  %v1571_v28 = vsel %vm1561_vm7, %v1548_v22, 0.0  ;;  %v1309_v23 = vpop.f32.mrf.mxu3 }
 0x2c8   :  { %1572 = vadd.xlane.f32.xlu2 %v1571_v28  ;;  %v1158_v28 = vpop.f32.mrf.mxu2 }
 0x2c9   :  { %v1517_v25 = vadd.f32 %v3465_v39, %v1497_v51  ;;  %v1159_v3 = vadd.f32 %v1158_v28, %v3452_v20 }
 0x2cb   :  { %v3496_v33 = vmax.f32 %v1517_v25, 0.0  ;;  %v1157_v25 = vadd.f32 %v1156_v63, %v3450_v15 }
 0x2cd   :  { %v1549_v35 = vmul.f32 %v3496_v33, %v3496_v33  ;;  %v1334_v30 = vadd.f32 %v1309_v23, %v1157_v25 }
 0x2ce   :  { %v1465_v54 = vpop.f32.mrf.mxu1 }
 0x2cf   :  { %v1498_v37 = vadd.f32 %v1465_v54, %v1329_v11  ;;  %v1574_v38 = vsel %vm1561_vm7, %v1549_v35, 0.0 }
 0x2d0   :  { %1575 = vadd.xlane.f32.xlu0 %v1574_v38 }
 0x2d1   :  { %v1518_v40 = vadd.f32 %v3465_v39, %v1498_v37  ;;  %v1311_v37 = vpop.f32.mrf.mxu3 }
 0x2d2   :  { %v1335_v15 = vadd.f32 %v1311_v37, %v1159_v3 }
 0x2d3   :  { %v3503_v42 = vmax.f32 %v1518_v40, 0.0  ;;  %v1161_v40 = vpop.f32.mrf.mxu2 }
 0x2d5   :  { %v1550_v47 = vmul.f32 %v3503_v42, %v3503_v42 }
 0x2d6   :  { %v1468_v49 = vpop.f32.mrf.mxu1 }
 0x2d7   :  { %v1499_v53 = vadd.f32 %v1468_v49, %v1330_v1  ;;  %v1577_v48 = vsel %vm1561_vm7, %v1550_v47, 0.0 }
 0x2d8   :  { %1578 = vadd.xlane.f32.xlu1 %v1577_v48 }
 0x2d9   :  { %v1519_v46 = vadd.f32 %v3465_v39, %v1499_v53  ;;  %v1314_v53 = vpop.f32.mrf.mxu3 }
 0x2db   :  { %v3510_v55 = vmax.f32 %v1519_v46, 0.0  ;;  %v1162_v46 = vadd.f32 %v1161_v40, %v3454_v21  ;;  %v1163_v12 = vpop.f32.mrf.mxu2 }
 0x2dd   :  { %v1551_v56 = vmul.f32 %v3510_v55, %v3510_v55  ;;  %v1336_v20 = vadd.f32 %v1314_v53, %v1162_v46 }
 0x2de   :  { %v1470_v34 = vpop.f32.mrf.mxu1 }
 0x2df   :  { %v1500_v8 = vadd.f32 %v1470_v34, %v1331_v18  ;;  %v1580_v24 = vsel %vm1561_vm7, %v1551_v56, 0.0 }
 0x2e0   :  { %1581 = vadd.xlane.f32.xlu2 %v1580_v24 }
 0x2e1   :  { %v1520_v60 = vadd.f32 %v3465_v39, %v1500_v8  ;;  %v1316_v58 = vpop.f32.mrf.mxu3 }
 0x2e3   :  { %v3517_v10 = vmax.f32 %v1520_v60, 0.0  ;;  %v1164_v60 = vadd.f32 %v1163_v12, %v3456_v45  ;;  %v1166_v21 = vpop.f32.mrf.mxu2 }
 0x2e5   :  { %v1552_v62 = vmul.f32 %v3517_v10, %v3517_v10 }
 0x2e6   :  { %v1473_v9 = vpop.f32.mrf.mxu1 }
 0x2e7   :  { %v1501_v59 = vadd.f32 %v1473_v9, %v1332_v52  ;;  %v1583_v7 = vsel %vm1561_vm7, %v1552_v62, 0.0  ;;  %v1337_v52 = vadd.f32 %v1316_v58, %v1164_v60  ;;  %v2847_v60 = vld [vmem:[%s3778_s5 + $0x20] sm:$0xff] }
 0x2e8   :  { %1584 = vadd.xlane.f32.xlu0 %v1583_v7  ;;  %v1167_v7 = vadd.f32 %v1166_v21, %v3458_v14  ;;  %v2843_v21 = vld [vmem:[%s3778_s5] sm:$0xff] }
 0x2e9   :  { %v1521_v41 = vadd.f32 %v3465_v39, %v1501_v59 }
 0x2eb   :  { %v3524_v13 = vmax.f32 %v1521_v41, 0.0  ;;  %v1319_v41 = vpop.f32.mrf.mxu3  ;;  %v1168_v31 = vpop.f32.mrf.mxu2 }
 0x2ec   :  { %v1338_v45 = vadd.f32 %v1319_v41, %v1167_v7 }
 0x2ed   :  { %v1553_v5 = vmul.f32 %v3524_v13, %v3524_v13 }
 0x2ee   :  { %v1475_v22 = vpop.f32.mrf.mxu1 }
 0x2ef   :  { %v1502_v26 = vadd.f32 %v1475_v22, %v1333_v16  ;;  %v1586_v17 = vsel %vm1561_vm7, %v1553_v5, 0.0  ;;  %v1169_v22 = vadd.f32 %v1168_v31, %v3460_v27  ;;  %v2849_v27 = vld [vmem:[%s3778_s5 + $0x30] sm:$0xff] }
 0x2f0   :  { %1587 = vadd.xlane.f32.xlu1 %v1586_v17  ;;  %1914 = vmatpush.bf16.msrb.mxu2 %v2849_v27 }
 0x2f1   :  { %v1522_v51 = vadd.f32 %v3465_v39, %v1502_v26 }
 0x2f3   :  { %v3537_v29 = vmax.f32 %v1522_v51, 0.0  ;;  %v1321_v17 = vpop.f32.mrf.mxu3 }
 0x2f4   :  { %v1339_v51 = vadd.f32 %v1321_v17, %v1169_v22 }
 0x2f5   :  { %v1554_v11 = vmul.f32 %v3537_v29, %v3537_v29 }
 0x2f6   :  { %v1478_v35 = vpop.f32.mrf.mxu1 }
 0x2f7   :  { %v1503_v4 = vadd.f32 %v1478_v35, %v1334_v30  ;;  %v1589_v54 = vsel %vm1561_vm7, %v1554_v11, 0.0 }
 0x2f8   :  { %1590 = vadd.xlane.f32.xlu2 %v1589_v54 }
 0x2f9   :  { %v1523_v38 = vadd.f32 %v3465_v39, %v1503_v4  ;;  %v2845_v4 = vld [vmem:[%s3778_s5 + $0x10] sm:$0xff] }
 0x2fa   :  { %1979 = vmatpush.bf16.msrb.mxu3 %v2845_v4 }
 0x2fb   :  { %v3544_v6 = vmax.f32 %v1523_v38, 0.0 }
 0x2fd   :  { %v1555_v1 = vmul.f32 %v3544_v6, %v3544_v6 }
 0x2fe   :  { %v1480_v47 = vpop.f32.mrf.mxu1 }
 0x2ff   :  { %v1504_v43 = vadd.f32 %v1480_v47, %v1335_v15  ;;  %v1592_v49 = vsel %vm1561_vm7, %v1555_v1, 0.0 }
 0x300   :  { %1593 = vadd.xlane.f32.xlu0 %v1592_v49 }
 0x301   :  { %v1524_v48 = vadd.f32 %v3465_v39, %v1504_v43 }
 0x303   :  { %v3551_v32 = vmax.f32 %v1524_v48, 0.0 }
 0x305   :  { %v1556_v18 = vmul.f32 %v3551_v32, %v3551_v32 }
 0x306   :  { %v1483_v56 = vpop.f32.mrf.mxu1 }
 0x307   :  { %v1505_v34 = vadd.f32 %v1483_v56, %v1336_v20  ;;  %v1595_v8 = vsel %vm1561_vm7, %v1556_v18, 0.0  ;;  %v2848_v20 = vld [vmem:[%s3778_s5 + $0x28] sm:$0xff] }
 0x308   :  { %1596 = vadd.xlane.f32.xlu1 %v1595_v8  ;;  %v2844_v18 = vld [vmem:[%s3778_s5 + $0x8] sm:$0xff]  ;;  %1915 = vmatpush.bf16.msrb.mxu2 %v2848_v20 }
 0x309   :  { %v1525_v24 = vadd.f32 %v3465_v39, %v1505_v34  ;;  %1980 = vmatpush.bf16.msrb.mxu3 %v2844_v18 }
 0x30b   :  { %v3558_v61 = vmax.f32 %v1525_v24, 0.0 }
 0x30c   :  { %1916 = vmatpush.bf16.msrb.mxu2 %v2847_v60 }
 0x30d   :  { %v1557_v62 = vmul.f32 %v3558_v61, %v3558_v61  ;;  %1981 = vmatpush.bf16.msrb.mxu3 %v2843_v21 }
 0x30e   :  { %v1485_v0 = vpop.f32.mrf.mxu1 }
 0x30f   :  { %v1506_v9 = vadd.f32 %v1485_v0, %v1337_v52  ;;  %v1598_v59 = vsel %vm1561_vm7, %v1557_v62, 0.0 }
 0x310   :  { %1599 = vadd.xlane.f32.xlu2 %v1598_v59 }
 0x311   :  { %v1526_v63 = vadd.f32 %v3465_v39, %v1506_v9 }
 0x313   :  { %v3565_v36 = vmax.f32 %v1526_v63, 0.0 }
 0x315   :  { %v1558_v50 = vmul.f32 %v3565_v36, %v3565_v36 }
 0x316   :  { %v1488_v16 = vpop.f32.mrf.mxu1 }
 0x317   :  { %v1507_v5 = vadd.f32 %v1488_v16, %v1338_v45  ;;  %v1601_v23 = vsel %vm1561_vm7, %v1558_v50, 0.0 }
 0x318   :  { %1602 = vadd.xlane.f32.xlu0 %v1601_v23 }
 0x319   :  { %v1527_v26 = vadd.f32 %v3465_v39, %v1507_v5 }
 0x31b   :  { %v3572_v14 = vmax.f32 %v1527_v26, 0.0 }
 0x31d   :  { %v1559_v28 = vmul.f32 %v3572_v14, %v3572_v14 }
 0x31e   :  { %v1490_v25 = vpop.f32.mrf.mxu1 }
 0x31f   :  { %v1508_v30 = vadd.f32 %v1490_v25, %v1339_v51  ;;  %v1604_v11 = vsel %vm1561_vm7, %v1559_v28, 0.0 }
 0x320   :  { %1605 = vadd.xlane.f32.xlu1 %v1604_v11 }
 0x321   :  { %v1528_v35 = vadd.f32 %v3465_v39, %v1508_v30 }
 0x323   :  { %v3584_v54 = vmax.f32 %v1528_v35, 0.0  ;;  %v1564_v37 = vpop.xlane.xlu2 %1563 }
 0x324   :  { %v1610_v38 = vmax.f32 %v1564_v37, 1e-24 }
 0x325   :  { %v1560_v40 = vmul.f32 %v3584_v54, %v3584_v54 }
 0x326   :  { %2938 = vrsqrt.f32 %v1610_v38  ;;  %vm1632_vm9 = vweird.f32 %v1610_v38 }
 0x327   :  { %v1607_v39 = vsel %vm1561_vm7, %v1560_v40, 0.0 }
 0x328   :  { %1608 = vadd.xlane.f32.xlu2 %v1607_v39 }
 0x32b   :  { %v1567_v3 = vpop.xlane.xlu0 %1566 }
 0x32c   :  { %v2939_v15 = vpop.eup %2938  ;;  %v1611_v1 = vmax.f32 %v1567_v3, 1e-24 }
 0x32d   :  { %v1627_v47 = vmul.f32 %v2939_v15, %v1610_v38  ;;  %vm1633_vm8 = vweird.f32 %v2939_v15 }
 0x32e   :  { %2940 = vrsqrt.f32 %v1611_v1  ;;  %vm1634_vm10 = vmor %vm1632_vm9, %vm1633_vm8  ;;  %vm1642_vm12 = vweird.f32 %v1611_v1 }
 0x32f   :  { %v1628_v43 = vmul.f32 %v2939_v15, %v1627_v47 }
 0x331   :  { %v1629_v49 = vmul.f32 0.5, %v1628_v43 }
 0x333   :  { %v1630_v53 = vsub.f32 1.5, %v1629_v49  ;;  %v1570_v48 = vpop.xlane.xlu1 %1569 }
 0x334   :  { %v2941_v46 = vpop.eup %2940  ;;  %v1612_v12 = vmax.f32 %v1570_v48, 1e-24 }
 0x335   :  { %v1631_v56 = vmul.f32 %v2939_v15, %v1630_v53  ;;  %v1637_v34 = vmul.f32 %v2941_v46, %v1611_v1  ;;  %vm1643_vm11 = vweird.f32 %v2941_v46 }
 0x336   :  { %2942 = vrsqrt.f32 %v1612_v12  ;;  %vm1644_vm13 = vmor %vm1642_vm12, %vm1643_vm11  ;;  %vm1652_vm15 = vweird.f32 %v1612_v12 }
 0x337   :  { %v1635_v8 = vsel %vm1634_vm10, %v2939_v15, %v1631_v56  ;;  %v1638_v24 = vmul.f32 %v2941_v46, %v1637_v34 }
 0x338   :  { %v1786_v58 = vmul.f32 %v1635_v8, %v3468_v44 }
 0x339   :  { %v1639_v52 = vmul.f32 0.5, %v1638_v24 }
 0x33a   :  { %1802 = vst.msk [vmem:[#allocation3] sm:$0xff] %vm1561_vm7, %v1786_v58 }
 0x33b   :  { %v1640_v62 = vsub.f32 1.5, %v1639_v52  ;;  %v1573_v0 = vpop.xlane.xlu2 %1572 }
 0x33c   :  { %v2943_v9 = vpop.eup %2942  ;;  %v1613_v59 = vmax.f32 %v1573_v0, 1e-24 }
 0x33d   :  { %v1641_v7 = vmul.f32 %v2941_v46, %v1640_v62  ;;  %v1647_v44 = vmul.f32 %v2943_v9, %v1612_v12  ;;  %vm1653_vm14 = vweird.f32 %v2943_v9 }
 0x33e   :  { %2944 = vrsqrt.f32 %v1613_v59  ;;  %vm1654_vm1 = vmor %vm1652_vm15, %vm1653_vm14  ;;  %vm1662_vm3 = vweird.f32 %v1613_v59 }
 0x33f   :  { %v1645_v63 = vsel %vm1644_vm13, %v2941_v46, %v1641_v7  ;;  %v1648_v41 = vmul.f32 %v2943_v9, %v1647_v44 }
 0x340   :  { %v1787_v45 = vmul.f32 %v1645_v63, %v3475_v57 }
 0x341   :  { %v1649_v50 = vmul.f32 0.5, %v1648_v41 }
 0x342   :  { %1803 = vst.msk [vmem:[#allocation3 + $0x8] sm:$0xff] %vm1561_vm7, %v1787_v45 }
 0x343   :  { %v1650_v31 = vsub.f32 1.5, %v1649_v50  ;;  %v1576_v16 = vpop.xlane.xlu0 %1575 }
 0x344   :  { %v2945_v5 = vpop.eup %2944  ;;  %v1614_v23 = vmax.f32 %v1576_v16, 1e-24 }
 0x345   :  { %v1651_v22 = vmul.f32 %v2943_v9, %v1650_v31  ;;  %v1657_v26 = vmul.f32 %v2945_v5, %v1613_v59  ;;  %vm1663_vm2 = vweird.f32 %v2945_v5 }
 0x346   :  { %2946 = vrsqrt.f32 %v1614_v23  ;;  %vm1664_vm4 = vmor %vm1662_vm3, %vm1663_vm2  ;;  %vm1672_vm6 = vweird.f32 %v1614_v23 }
 0x347   :  { %v1655_v17 = vsel %vm1654_vm1, %v2943_v9, %v1651_v22  ;;  %v1658_v51 = vmul.f32 %v2945_v5, %v1657_v26 }
 0x348   :  { %v1788_v28 = vmul.f32 %v1655_v17, %v3482_v2 }
 0x349   :  { %v1659_v25 = vmul.f32 0.5, %v1658_v51  ;;  %v1846_v46 = vld [vmem:[#allocation3 + $0x1] ss:$2 sm:$0xff]  ;;  %v1818_v12 = vld [vmem:[#allocation3] ss:$2 sm:$0xff] }
 0x34a   :  { %1804 = vst.msk [vmem:[#allocation3 + $0x10] sm:$0xff] %vm1561_vm7, %v1788_v28 }
 0x34b   :  { %v1660_v57 = vsub.f32 1.5, %v1659_v25  ;;  %v1579_v30 = vpop.xlane.xlu1 %1578 }
 0x34c   :  { %v2947_v11 = vpop.eup %2946  ;;  %v1615_v35 = vmax.f32 %v1579_v30, 1e-24 }
 0x34d   :  { %v1661_v27 = vmul.f32 %v2945_v5, %v1660_v57  ;;  %v1667_v4 = vmul.f32 %v2947_v11, %v1614_v23  ;;  %vm1673_vm5 = vweird.f32 %v2947_v11 }
 0x34e   :  { %2948 = vrsqrt.f32 %v1615_v35  ;;  %vm1674_vm8 = vmor %vm1672_vm6, %vm1673_vm5  ;;  %vm1682_vm10 = vweird.f32 %v1615_v35 }
 0x34f   :  { %v1665_v37 = vsel %vm1664_vm4, %v2945_v5, %v1661_v27  ;;  %v1668_v38 = vmul.f32 %v2947_v11, %v1667_v4 }
 0x350   :  { %v1789_v40 = vmul.f32 %v1665_v37, %v3489_v19 }
 0x351   :  { %v1669_v39 = vmul.f32 0.5, %v1668_v38 }
 0x352   :  { %1805 = vst.msk [vmem:[#allocation3 + $0x18] sm:$0xff] %vm1561_vm7, %v1789_v40 }
 0x353   :  { %v1670_v2 = vsub.f32 1.5, %v1669_v39  ;;  %v1582_v3 = vpop.xlane.xlu2 %1581 }
 0x354   :  { %v2949_v15 = vpop.eup %2948  ;;  %v1616_v1 = vmax.f32 %v1582_v3, 1e-24 }
 0x355   :  { %v1671_v47 = vmul.f32 %v2947_v11, %v1670_v2  ;;  %v1677_v43 = vmul.f32 %v2949_v15, %v1615_v35  ;;  %vm1683_vm9 = vweird.f32 %v2949_v15 }
 0x356   :  { %2950 = vrsqrt.f32 %v1616_v1  ;;  %vm1684_vm11 = vmor %vm1682_vm10, %vm1683_vm9  ;;  %vm1692_vm13 = vweird.f32 %v1616_v1 }
 0x357   :  { %v1675_v49 = vsel %vm1674_vm8, %v2947_v11, %v1671_v47  ;;  %v1678_v53 = vmul.f32 %v2949_v15, %v1677_v43 }
 0x358   :  { %v1790_v48 = vmul.f32 %v1675_v49, %v3496_v33 }
 0x359   :  { %v1679_v19 = vmul.f32 0.5, %v1678_v53  ;;  %v1848_v20 = vld [vmem:[#allocation3 + $0x11] ss:$2 sm:$0xff]  ;;  %v1820_v18 = vld [vmem:[#allocation3 + $0x10] ss:$2 sm:$0xff] }
 0x35a   :  { %1806 = vst.msk [vmem:[#allocation3 + $0x20] sm:$0xff] %vm1561_vm7, %v1790_v48  ;;  %v1861_v56 = vpack.c.bf16 %v1848_v20, %v1846_v46  ;;  %v1833_v34 = vpack.c.bf16 %v1820_v18, %v1818_v12 }
 0x35b   :  { %v1680_v8 = vsub.f32 1.5, %v1679_v19  ;;  %v1585_v24 = vpop.xlane.xlu0 %1584 }
 0x35c   :  { %v2951_v58 = vpop.eup %2950  ;;  %v1617_v60 = vmax.f32 %v1585_v24, 1e-24  ;;  %2696 = vmatmul.msk.bf16.vlgmr.msrb.gmra.mxu2 %vm1561_vm7, %v1861_v56  ;;  %2716 = vmatmul.msk.bf16.vlgmr.msrb.gmra.mxu3 %vm1561_vm7, %v1833_v34 }
 0x35d   :  { %v1681_v21 = vmul.f32 %v2949_v15, %v1680_v8  ;;  %v1687_v33 = vmul.f32 %v2951_v58, %v1616_v1  ;;  %vm1693_vm12 = vweird.f32 %v2951_v58 }
 0x35e   :  { %2952 = vrsqrt.f32 %v1617_v60  ;;  %vm1694_vm14 = vmor %vm1692_vm13, %vm1693_vm12  ;;  %vm1702_vm1 = vweird.f32 %v1617_v60 }
 0x35f   :  { %v1685_v52 = vsel %vm1684_vm11, %v2949_v15, %v1681_v21  ;;  %v1688_v62 = vmul.f32 %v2951_v58, %v1687_v33 }
 0x360   :  { %v1791_v0 = vmul.f32 %v1685_v52, %v3503_v42 }
 0x361   :  { %v1689_v9 = vmul.f32 0.5, %v1688_v62 }
 0x362   :  { %1807 = vst.msk [vmem:[#allocation3 + $0x28] sm:$0xff] %vm1561_vm7, %v1791_v0 }
 0x363   :  { %v1690_v59 = vsub.f32 1.5, %v1689_v9  ;;  %v1588_v7 = vpop.xlane.xlu1 %1587 }
 0x364   :  { %v2953_v44 = vpop.eup %2952  ;;  %v1618_v63 = vmax.f32 %v1588_v7, 1e-24 }
 0x365   :  { %v1691_v41 = vmul.f32 %v2951_v58, %v1690_v59  ;;  %v1697_v45 = vmul.f32 %v2953_v44, %v1617_v60  ;;  %vm1703_vm15 = vweird.f32 %v2953_v44 }
 0x366   :  { %2954 = vrsqrt.f32 %v1618_v63  ;;  %vm1704_vm2 = vmor %vm1702_vm1, %vm1703_vm15  ;;  %vm1712_vm4 = vweird.f32 %v1618_v63 }
 0x367   :  { %v1695_v50 = vsel %vm1694_vm14, %v2951_v58, %v1691_v41  ;;  %v1698_v31 = vmul.f32 %v2953_v44, %v1697_v45 }
 0x368   :  { %v1792_v16 = vmul.f32 %v1695_v50, %v3510_v55 }
 0x369   :  { %v1699_v5 = vmul.f32 0.5, %v1698_v31  ;;  %v1850_v2 = vld [vmem:[#allocation3 + $0x21] ss:$2 sm:$0xff]  ;;  %v1822_v3 = vld [vmem:[#allocation3 + $0x20] ss:$2 sm:$0xff] }
 0x36a   :  { %1808 = vst.msk [vmem:[#allocation3 + $0x30] sm:$0xff] %vm1561_vm7, %v1792_v16 }
 0x36b   :  { %v1700_v42 = vsub.f32 1.5, %v1699_v5  ;;  %v1591_v23 = vpop.xlane.xlu2 %1590 }
 0x36c   :  { %v2955_v22 = vpop.eup %2954  ;;  %v1619_v26 = vmax.f32 %v1591_v23, 1e-24 }
 0x36d   :  { %v1701_v17 = vmul.f32 %v2953_v44, %v1700_v42  ;;  %v1707_v51 = vmul.f32 %v2955_v22, %v1618_v63  ;;  %vm1713_vm3 = vweird.f32 %v2955_v22 }
 0x36e   :  { %2956 = vrsqrt.f32 %v1619_v26  ;;  %vm1714_vm5 = vmor %vm1712_vm4, %vm1713_vm3  ;;  %vm1722_vm8 = vweird.f32 %v1619_v26 }
 0x36f   :  { %v1705_v28 = vsel %vm1704_vm2, %v2953_v44, %v1701_v17  ;;  %v1708_v25 = vmul.f32 %v2955_v22, %v1707_v51 }
 0x370   :  { %v1793_v57 = vmul.f32 %v1705_v28, %v3517_v10 }
 0x371   :  { %v1709_v30 = vmul.f32 0.5, %v1708_v25 }
 0x372   :  { %1809 = vst.msk [vmem:[#allocation3 + $0x38] sm:$0xff] %vm1561_vm7, %v1793_v57 }
 0x373   :  { %v1710_v55 = vsub.f32 1.5, %v1709_v30  ;;  %v1594_v11 = vpop.xlane.xlu0 %1593 }
 0x374   :  { %v2957_v35 = vpop.eup %2956  ;;  %v1620_v27 = vmax.f32 %v1594_v11, 1e-24 }
 0x375   :  { %v1711_v4 = vmul.f32 %v2955_v22, %v1710_v55  ;;  %v1717_v37 = vmul.f32 %v2957_v35, %v1619_v26  ;;  %vm1723_vm6 = vweird.f32 %v2957_v35 }
 0x376   :  { %2958 = vrsqrt.f32 %v1620_v27  ;;  %vm1724_vm9 = vmor %vm1722_vm8, %vm1723_vm6  ;;  %vm1732_vm11 = vweird.f32 %v1620_v27 }
 0x377   :  { %v1715_v38 = vsel %vm1714_vm5, %v2955_v22, %v1711_v4  ;;  %v1718_v40 = vmul.f32 %v2957_v35, %v1717_v37 }
 0x378   :  { %v1794_v39 = vmul.f32 %v1715_v38, %v3524_v13 }
 0x379   :  { %v1719_v10 = vmul.f32 0.5, %v1718_v40  ;;  %v1852_v15 = vld [vmem:[#allocation3 + $0x31] ss:$2 sm:$0xff]  ;;  %v1824_v1 = vld [vmem:[#allocation3 + $0x30] ss:$2 sm:$0xff] }
 0x37a   :  { %1810 = vst.msk [vmem:[#allocation3 + $0x40] sm:$0xff] %vm1561_vm7, %v1794_v39  ;;  %v1862_v47 = vpack.c.bf16 %v1852_v15, %v1850_v2  ;;  %v1834_v43 = vpack.c.bf16 %v1824_v1, %v1822_v3 }
 0x37b   :  { %v1720_v49 = vsub.f32 1.5, %v1719_v10  ;;  %v1597_v53 = vpop.xlane.xlu1 %1596 }
 0x37c   :  { %v2959_v48 = vpop.eup %2958  ;;  %v1621_v46 = vmax.f32 %v1597_v53, 1e-24  ;;  %2697 = vmatmul.msk.bf16.gmra.mxu2 %vm1561_vm7, %v1862_v47  ;;  %2717 = vmatmul.msk.bf16.gmra.mxu3 %vm1561_vm7, %v1834_v43 }
 0x37d   :  { %v1721_v12 = vmul.f32 %v2957_v35, %v1720_v49  ;;  %v1727_v13 = vmul.f32 %v2959_v48, %v1620_v27  ;;  %vm1733_vm10 = vweird.f32 %v2959_v48 }
 0x37e   :  { %2960 = vrsqrt.f32 %v1621_v46  ;;  %vm1734_vm12 = vmor %vm1732_vm11, %vm1733_vm10  ;;  %vm1742_vm14 = vweird.f32 %v1621_v46 }
 0x37f   :  { %v1725_v19 = vsel %vm1724_vm9, %v2957_v35, %v1721_v12  ;;  %v1728_v20 = vmul.f32 %v2959_v48, %v1727_v13 }
 0x380   :  { %v1795_v18 = vmul.f32 %v1725_v19, %v3537_v29 }
 0x381   :  { %v1729_v56 = vmul.f32 0.5, %v1728_v20 }
 0x382   :  { %1811 = vst.msk [vmem:[#allocation3 + $0x48] sm:$0xff] %vm1561_vm7, %v1795_v18 }
 0x383   :  { %v1730_v34 = vsub.f32 1.5, %v1729_v56  ;;  %v1600_v8 = vpop.xlane.xlu2 %1599 }
 0x384   :  { %v2961_v24 = vpop.eup %2960  ;;  %v1622_v58 = vmax.f32 %v1600_v8, 1e-24 }
 0x385   :  { %v1731_v60 = vmul.f32 %v2959_v48, %v1730_v34  ;;  %v1737_v21 = vmul.f32 %v2961_v24, %v1621_v46  ;;  %vm1743_vm13 = vweird.f32 %v2961_v24 }
 0x386   :  { %2962 = vrsqrt.f32 %v1622_v58  ;;  %vm1744_vm15 = vmor %vm1742_vm14, %vm1743_vm13  ;;  %vm1752_vm2 = vweird.f32 %v1622_v58 }
 0x387   :  { %v1735_v33 = vsel %vm1734_vm12, %v2959_v48, %v1731_v60  ;;  %v1738_v52 = vmul.f32 %v2961_v24, %v1737_v21 }
 0x388   :  { %v1796_v62 = vmul.f32 %v1735_v33, %v3544_v6 }
 0x389   :  { %v1739_v0 = vmul.f32 0.5, %v1738_v52  ;;  %v1854_v28 = vld [vmem:[#allocation3 + $0x41] ss:$2 sm:$0xff]  ;;  %v1826_v25 = vld [vmem:[#allocation3 + $0x40] ss:$2 sm:$0xff] }
 0x38a   :  { %1812 = vst.msk [vmem:[#allocation3 + $0x50] sm:$0xff] %vm1561_vm7, %v1796_v62 }
 0x38b   :  { %v1740_v29 = vsub.f32 1.5, %v1739_v0  ;;  %v1603_v9 = vpop.xlane.xlu0 %1602 }
 0x38c   :  { %v2963_v59 = vpop.eup %2962  ;;  %v1623_v7 = vmax.f32 %v1603_v9, 1e-24 }
 0x38d   :  { %v1741_v44 = vmul.f32 %v2961_v24, %v1740_v29  ;;  %v1747_v63 = vmul.f32 %v2963_v59, %v1622_v58  ;;  %vm1753_vm1 = vweird.f32 %v2963_v59 }
 0x38e   :  { %2964 = vrsqrt.f32 %v1623_v7  ;;  %vm1754_vm3 = vmor %vm1752_vm2, %vm1753_vm1  ;;  %vm1762_vm5 = vweird.f32 %v1623_v7 }
 0x38f   :  { %v1745_v41 = vsel %vm1744_vm15, %v2961_v24, %v1741_v44  ;;  %v1748_v45 = vmul.f32 %v2963_v59, %v1747_v63 }
 0x390   :  { %v1797_v50 = vmul.f32 %v1745_v41, %v3551_v32 }
 0x391   :  { %v1749_v31 = vmul.f32 0.5, %v1748_v45 }
 0x392   :  { %1813 = vst.msk [vmem:[#allocation3 + $0x58] sm:$0xff] %vm1561_vm7, %v1797_v50 }
 0x393   :  { %v1750_v6 = vsub.f32 1.5, %v1749_v31  ;;  %v1606_v16 = vpop.xlane.xlu1 %1605 }
 0x394   :  { %v2965_v5 = vpop.eup %2964  ;;  %v1624_v42 = vmax.f32 %v1606_v16, 1e-24 }
 0x395   :  { %v1751_v23 = vmul.f32 %v2963_v59, %v1750_v6  ;;  %v1757_v22 = vmul.f32 %v2965_v5, %v1623_v7  ;;  %vm1763_vm4 = vweird.f32 %v2965_v5 }
 0x396   :  { %2966 = vrsqrt.f32 %v1624_v42  ;;  %vm1764_vm6 = vmor %vm1762_vm5, %vm1763_vm4  ;;  %vm1772_vm9 = vweird.f32 %v1624_v42 }
 0x397   :  { %v1755_v26 = vsel %vm1754_vm3, %v2963_v59, %v1751_v23  ;;  %v1758_v17 = vmul.f32 %v2965_v5, %v1757_v22 }
 0x398   :  { %v1798_v51 = vmul.f32 %v1755_v26, %v3558_v61 }
 0x399   :  { %v1759_v32 = vmul.f32 0.5, %v1758_v17  ;;  %v1856_v57 = vld [vmem:[#allocation3 + $0x51] ss:$2 sm:$0xff]  ;;  %v1828_v30 = vld [vmem:[#allocation3 + $0x50] ss:$2 sm:$0xff] }
 0x39a   :  { %1814 = vst.msk [vmem:[#allocation3 + $0x60] sm:$0xff] %vm1561_vm7, %v1798_v51  ;;  %v1863_v55 = vpack.c.bf16 %v1856_v57, %v1854_v28  ;;  %v1835_v11 = vpack.c.bf16 %v1828_v30, %v1826_v25 }
 0x39b   :  { %v1760_v35 = vsub.f32 1.5, %v1759_v32  ;;  %v1609_v27 = vpop.xlane.xlu2 %1608 }
 0x39c   :  { %v2967_v4 = vpop.eup %2966  ;;  %v1625_v37 = vmax.f32 %v1609_v27, 1e-24  ;;  %2698 = vmatmul.msk.bf16.gmra.mxu2 %vm1561_vm7, %v1863_v55  ;;  %2718 = vmatmul.msk.bf16.gmra.mxu3 %vm1561_vm7, %v1835_v11 }
 0x39d   :  { %v1761_v38 = vmul.f32 %v2965_v5, %v1760_v35  ;;  %v1767_v61 = vmul.f32 %v2967_v4, %v1624_v42  ;;  %vm1773_vm8 = vweird.f32 %v2967_v4 }
 0x39e   :  { %2968 = vrsqrt.f32 %v1625_v37  ;;  %vm1774_vm10 = vmor %vm1772_vm9, %vm1773_vm8  ;;  %vm1782_vm12 = vweird.f32 %v1625_v37 }
 0x39f   :  { %v1765_v40 = vsel %vm1764_vm6, %v2965_v5, %v1761_v38  ;;  %v1768_v39 = vmul.f32 %v2967_v4, %v1767_v61 }
 0x3a0   :  { %v1799_v2 = vmul.f32 %v1765_v40, %v3565_v36 }
 0x3a1   :  { %v1769_v3 = vmul.f32 0.5, %v1768_v39 }
 0x3a2   :  { %1815 = vst.msk [vmem:[#allocation3 + $0x68] sm:$0xff] %vm1561_vm7, %v1799_v2 }
 0x3a3   :  { %v1770_v10 = vsub.f32 1.5, %v1769_v3 }
 0x3a4   :  { %v2969_v15 = vpop.eup %2968 }
 0x3a5   :  { %v1771_v1 = vmul.f32 %v2967_v4, %v1770_v10  ;;  %v1777_v47 = vmul.f32 %v2969_v15, %v1625_v37  ;;  %vm1783_vm11 = vweird.f32 %v2969_v15 }
 0x3a6   :  { %vm1784_vm13 = vmor %vm1782_vm12, %vm1783_vm11 }
 0x3a7   :  { %v1775_v43 = vsel %vm1774_vm10, %v2967_v4, %v1771_v1  ;;  %v1778_v49 = vmul.f32 %v2969_v15, %v1777_v47 }
 0x3a8   :  { %v1800_v53 = vmul.f32 %v1775_v43, %v3572_v14  ;;  %v2870_v14 = vld [vmem:[%s3779_s6] ss:$0 sm:$0xff] }
 0x3a9   :  { %v1779_v48 = vmul.f32 0.5, %v1778_v49  ;;  %v1858_v19 = vld [vmem:[#allocation3 + $0x61] ss:$2 sm:$0xff]  ;;  %v1830_v18 = vld [vmem:[#allocation3 + $0x60] ss:$2 sm:$0xff] }
 0x3aa   :  { %1816 = vst.msk [vmem:[#allocation3 + $0x70] sm:$0xff] %vm1561_vm7, %v1800_v53 }
 0x3ab   :  { %v1780_v46 = vsub.f32 1.5, %v1779_v48 }
 0x3ad   :  { %v1781_v36 = vmul.f32 %v2969_v15, %v1780_v46 }
 0x3af   :  { %v1785_v12 = vsel %vm1784_vm13, %v2969_v15, %v1781_v36 }
 0x3b0   :  { %v1801_v13 = vmul.f32 %v1785_v12, %v3584_v54 }
 0x3b2   :  { %1817 = vst.msk [vmem:[#allocation3 + $0x78] sm:$0xff] %vm1561_vm7, %v1801_v13 }
 0x3b9   :  { %v1860_v20 = vld [vmem:[#allocation3 + $0x71] ss:$2 sm:$0xff]  ;;  %v1832_v56 = vld [vmem:[#allocation3 + $0x70] ss:$2 sm:$0xff] }
 0x3ba   :  { %v1864_v34 = vpack.c.bf16 %v1860_v20, %v1858_v19  ;;  %v1836_v8 = vpack.c.bf16 %v1832_v56, %v1830_v18 }
 0x3bc   :  { %2699 = vmatmul.msk.bf16.gmra.mxu2 %vm1561_vm7, %v1864_v34  ;;  %2719 = vmatmul.msk.bf16.gmra.mxu3 %vm1561_vm7, %v1836_v8 }
 0x3df   :  { %v1918_v24 = vpop.f32.mrf.mxu2  ;;  %v1983_v58 = vpop.f32.mrf.mxu3 }
 0x3e0   :  { %v1984_v60 = vadd.f32 %v1983_v58, %v1918_v24 }
 0x3e2   :  { %v2007_v54 = vadd.f32 %v2870_v14, %v1984_v60 }
 0x3e4   :  { %v3644_v21 = vmax.f32 %v2007_v54, 0.0 }
 0x3e6   :  { %v2023_v33 = vmul.f32 %v3644_v21, %v3644_v21 }
 0x3e7   :  { %v1920_v52 = vpop.f32.mrf.mxu2  ;;  %v1985_v62 = vpop.f32.mrf.mxu3 }
 0x3e8   :  { %v1986_v0 = vadd.f32 %v1985_v62, %v1920_v52  ;;  %v2031_v29 = vsel %vm183_vm0, %v2023_v33, 0.0 }
 0x3e9   :  { %2032 = vadd.xlane.f32.xlu0 %v2031_v29 }
 0x3ea   :  { %v2008_v9 = vadd.f32 %v2870_v14, %v1986_v0 }
 0x3ec   :  { %v3649_v59 = vmax.f32 %v2008_v9, 0.0 }
 0x3ee   :  { %v2024_v7 = vmul.f32 %v3649_v59, %v3649_v59 }
 0x3f0   :  { %v2034_v44 = vsel %vm183_vm0, %v2024_v7, 0.0 }
 0x3f1   :  { %2035 = vadd.xlane.f32.xlu1 %v2034_v44 }
 0x3ff   :  { %v1923_v63 = vpop.f32.mrf.mxu2  ;;  %v1988_v41 = vpop.f32.mrf.mxu3 }
 0x400   :  { %v1989_v45 = vadd.f32 %v1988_v41, %v1923_v63 }
 0x402   :  { %v2009_v50 = vadd.f32 %v2870_v14, %v1989_v45 }
 0x404   :  { %v3654_v31 = vmax.f32 %v2009_v50, 0.0 }
 0x406   :  { %v2025_v6 = vmul.f32 %v3654_v31, %v3654_v31 }
 0x407   :  { %v1925_v16 = vpop.f32.mrf.mxu2  ;;  %v1990_v5 = vpop.f32.mrf.mxu3 }
 0x408   :  { %v1991_v42 = vadd.f32 %v1990_v5, %v1925_v16  ;;  %v2037_v23 = vsel %vm183_vm0, %v2025_v6, 0.0 }
 0x409   :  { %2038 = vadd.xlane.f32.xlu2 %v2037_v23 }
 0x40a   :  { %v2010_v22 = vadd.f32 %v2870_v14, %v1991_v42 }
 0x40c   :  { %v3659_v26 = vmax.f32 %v2010_v22, 0.0 }
 0x40e   :  { %v2026_v17 = vmul.f32 %v3659_v26, %v3659_v26 }
 0x410   :  { %v2040_v51 = vsel %vm183_vm0, %v2026_v17, 0.0 }
 0x411   :  { %2041 = vadd.xlane.f32.xlu0 %v2040_v51 }
 0x41f   :  { %v1928_v28 = vpop.f32.mrf.mxu2  ;;  %v1993_v25 = vpop.f32.mrf.mxu3 }
 0x420   :  { %v1994_v32 = vadd.f32 %v1993_v25, %v1928_v28 }
 0x422   :  { %v2011_v57 = vadd.f32 %v2870_v14, %v1994_v32 }
 0x424   :  { %v3664_v30 = vmax.f32 %v2011_v57, 0.0 }
 0x426   :  { %v2027_v55 = vmul.f32 %v3664_v30, %v3664_v30 }
 0x427   :  { %v1930_v11 = vpop.f32.mrf.mxu2  ;;  %v1995_v35 = vpop.f32.mrf.mxu3 }
 0x428   :  { %v1996_v27 = vadd.f32 %v1995_v35, %v1930_v11  ;;  %v2043_v4 = vsel %vm183_vm0, %v2027_v55, 0.0  ;;  %v2854_v35 = vld [vmem:[%s3780_s7 + $0x18] sm:$0xff] }
 0x429   :  { %2044 = vadd.xlane.f32.xlu1 %v2043_v4  ;;  %2197 = vmatpush.bf16.msra.mxu2 %v2854_v35 }
 0x42a   :  { %v2012_v37 = vadd.f32 %v2870_v14, %v1996_v27 }
 0x42c   :  { %v3669_v38 = vmax.f32 %v2012_v37, 0.0 }
 0x42e   :  { %v2028_v61 = vmul.f32 %v3669_v38, %v3669_v38 }
 0x430   :  { %v2046_v40 = vsel %vm183_vm0, %v2028_v61, 0.0 }
 0x431   :  { %2047 = vadd.xlane.f32.xlu2 %v2046_v40 }
 0x43f   :  { %v1933_v39 = vpop.f32.mrf.mxu2  ;;  %v1998_v2 = vpop.f32.mrf.mxu3 }
 0x440   :  { %v1999_v3 = vadd.f32 %v1998_v2, %v1933_v39 }
 0x442   :  { %v2013_v10 = vadd.f32 %v2870_v14, %v1999_v3 }
 0x444   :  { %v3674_v15 = vmax.f32 %v2013_v10, 0.0 }
 0x446   :  { %v2029_v1 = vmul.f32 %v3674_v15, %v3674_v15 }
 0x447   :  { %v1935_v47 = vpop.f32.mrf.mxu2  ;;  %v2000_v43 = vpop.f32.mrf.mxu3 }
 0x448   :  { %v2001_v49 = vadd.f32 %v2000_v43, %v1935_v47  ;;  %v2049_v53 = vsel %vm183_vm0, %v2029_v1, 0.0 }
 0x449   :  { %2050 = vadd.xlane.f32.xlu0 %v2049_v53 }
 0x44a   :  { %v2014_v48 = vadd.f32 %v2870_v14, %v2001_v49 }
 0x44c   :  { %v3679_v46 = vmax.f32 %v2014_v48, 0.0 }
 0x44e   :  { %v2030_v36 = vmul.f32 %v3679_v46, %v3679_v46 }
 0x450   :  { %v2052_v12 = vsel %vm183_vm0, %v2030_v36, 0.0 }
 0x451   :  { %2053 = vadd.xlane.f32.xlu1 %v2052_v12 }
 0x45c   :  { %v2033_v13 = vpop.xlane.xlu0 %2032 }
 0x45d   :  { %v2055_v19 = vmax.f32 %v2033_v13, 1e-24 }
 0x45f   :  { %2970 = vrsqrt.f32 %v2055_v19  ;;  %vm2069_vm15 = vweird.f32 %v2055_v19 }
 0x464   :  { %v2036_v20 = vpop.xlane.xlu1 %2035 }
 0x465   :  { %v2971_v18 = vpop.eup %2970  ;;  %v2056_v56 = vmax.f32 %v2036_v20, 1e-24  ;;  %v2853_v20 = vld [vmem:[%s3780_s7 + $0x10] sm:$0xff] }
 0x466   :  { %v2064_v34 = vmul.f32 %v2971_v18, %v2055_v19  ;;  %vm2070_vm14 = vweird.f32 %v2971_v18  ;;  %2198 = vmatpush.bf16.msra.mxu2 %v2853_v20 }
 0x467   :  { %2972 = vrsqrt.f32 %v2056_v56  ;;  %vm2071_vm1 = vmor %vm2069_vm15, %vm2070_vm14  ;;  %vm2079_vm3 = vweird.f32 %v2056_v56 }
 0x468   :  { %v2065_v8 = vmul.f32 %v2971_v18, %v2064_v34 }
 0x46a   :  { %v2066_v24 = vmul.f32 0.5, %v2065_v8 }
 0x46c   :  { %v2067_v58 = vsub.f32 1.5, %v2066_v24 }
 0x46d   :  { %v2973_v14 = vpop.eup %2972 }
 0x46e   :  { %v2068_v60 = vmul.f32 %v2971_v18, %v2067_v58  ;;  %v2074_v54 = vmul.f32 %v2973_v14, %v2056_v56  ;;  %vm2080_vm2 = vweird.f32 %v2973_v14 }
 0x46f   :  { %vm2081_vm4 = vmor %vm2079_vm3, %vm2080_vm2 }
 0x470   :  { %v2072_v33 = vsel %vm2071_vm1, %v2971_v18, %v2068_v60  ;;  %v2075_v52 = vmul.f32 %v2973_v14, %v2074_v54  ;;  %v2858_v60 = vld [vmem:[%s3780_s7 + $0x38] sm:$0xff]  ;;  %v2855_v54 = vld [vmem:[%s3780_s7 + $0x20] sm:$0xff] }
 0x471   :  { %v2143_v62 = vmul.f32 %v2072_v33, %v3644_v21 }
 0x472   :  { %v2076_v0 = vmul.f32 0.5, %v2075_v52  ;;  %v2857_v52 = vld [vmem:[%s3780_s7 + $0x30] sm:$0xff] }
 0x473   :  { %2151 = vst.msk [vmem:[#allocation4] sm:$0xff] %vm183_vm0, %v2143_v62 }
 0x474   :  { %v2077_v29 = vsub.f32 1.5, %v2076_v0 }
 0x476   :  { %v2078_v9 = vmul.f32 %v2973_v14, %v2077_v29 }
 0x478   :  { %v2082_v7 = vsel %vm2081_vm4, %v2973_v14, %v2078_v9 }
 0x479   :  { %v2144_v44 = vmul.f32 %v2082_v7, %v3649_v59 }
 0x47b   :  { %2152 = vst.msk [vmem:[#allocation4 + $0x8] sm:$0xff] %vm183_vm0, %v2144_v44 }
 0x47c   :  { %v2039_v63 = vpop.xlane.xlu2 %2038 }
 0x47d   :  { %v2057_v41 = vmax.f32 %v2039_v63, 1e-24 }
 0x47f   :  { %2974 = vrsqrt.f32 %v2057_v41  ;;  %vm2089_vm6 = vweird.f32 %v2057_v41 }
 0x484   :  { %v2042_v45 = vpop.xlane.xlu0 %2041 }
 0x485   :  { %v2975_v50 = vpop.eup %2974  ;;  %v2058_v6 = vmax.f32 %v2042_v45, 1e-24 }
 0x486   :  { %v2084_v21 = vmul.f32 %v2975_v50, %v2057_v41  ;;  %vm2090_vm5 = vweird.f32 %v2975_v50 }
 0x487   :  { %2976 = vrsqrt.f32 %v2058_v6  ;;  %vm2091_vm8 = vmor %vm2089_vm6, %vm2090_vm5  ;;  %vm2099_vm10 = vweird.f32 %v2058_v6 }
 0x488   :  { %v2085_v16 = vmul.f32 %v2975_v50, %v2084_v21 }
 0x48a   :  { %v2086_v5 = vmul.f32 0.5, %v2085_v16 }
 0x48c   :  { %v2087_v42 = vsub.f32 1.5, %v2086_v5 }
 0x48d   :  { %v2977_v23 = vpop.eup %2976 }
 0x48e   :  { %v2088_v22 = vmul.f32 %v2975_v50, %v2087_v42  ;;  %v2094_v17 = vmul.f32 %v2977_v23, %v2058_v6  ;;  %vm2100_vm9 = vweird.f32 %v2977_v23 }
 0x48f   :  { %vm2101_vm11 = vmor %vm2099_vm10, %vm2100_vm9 }
 0x490   :  { %v2092_v59 = vsel %vm2091_vm8, %v2975_v50, %v2088_v22  ;;  %v2095_v51 = vmul.f32 %v2977_v23, %v2094_v17 }
 0x491   :  { %v2145_v28 = vmul.f32 %v2092_v59, %v3654_v31  ;;  %v2852_v31 = vld [vmem:[%s3780_s7 + $0x8] sm:$0xff] }
 0x492   :  { %v2096_v25 = vmul.f32 0.5, %v2095_v51  ;;  %2225 = vmatpush.bf16.msra.mxu3 %v2852_v31 }
 0x493   :  { %2153 = vst.msk [vmem:[#allocation4 + $0x10] sm:$0xff] %vm183_vm0, %v2145_v28  ;;  %v2859_v28 = vld [vmem:[%s3780_s7 + $0x40] sm:$0xff] }
 0x494   :  { %v2097_v32 = vsub.f32 1.5, %v2096_v25 }
 0x496   :  { %v2098_v57 = vmul.f32 %v2977_v23, %v2097_v32 }
 0x498   :  { %v2102_v55 = vsel %vm2101_vm11, %v2977_v23, %v2098_v57 }
 0x499   :  { %v2146_v11 = vmul.f32 %v2102_v55, %v3659_v26 }
 0x49b   :  { %2154 = vst.msk [vmem:[#allocation4 + $0x18] sm:$0xff] %vm183_vm0, %v2146_v11 }
 0x49c   :  { %v2045_v27 = vpop.xlane.xlu1 %2044 }
 0x49d   :  { %v2059_v4 = vmax.f32 %v2045_v27, 1e-24 }
 0x49f   :  { %2978 = vrsqrt.f32 %v2059_v4  ;;  %vm2109_vm13 = vweird.f32 %v2059_v4 }
 0x4a2   :  { %v2168_v16 = vld [vmem:[#allocation4 + $0x1] ss:$8 sm:$0xf]  ;;  %v2159_v5 = vld [vmem:[#allocation4] ss:$8 sm:$0xf] }
 0x4a3   :  { %v2233_v57 = vld [vmem:[#allocation4 + $0x2] ss:$8 sm:$0xf]  ;;  %v2271_v55 = vld [vmem:[#allocation4 + $0x3] ss:$8 sm:$0xf] }
 0x4a4   :  { %v2048_v37 = vpop.xlane.xlu2 %2047 }
 0x4a5   :  { %v2979_v61 = vpop.eup %2978  ;;  %v2060_v40 = vmax.f32 %v2048_v37, 1e-24  ;;  %v2309_v37 = vld [vmem:[#allocation4 + $0x4] ss:$8 sm:$0xf] }
 0x4a6   :  { %v2104_v39 = vmul.f32 %v2979_v61, %v2059_v4  ;;  %vm2110_vm12 = vweird.f32 %v2979_v61 }
 0x4a7   :  { %2980 = vrsqrt.f32 %v2060_v40  ;;  %vm2111_vm14 = vmor %vm2109_vm13, %vm2110_vm12  ;;  %vm2119_vm1 = vweird.f32 %v2060_v40 }
 0x4a8   :  { %v2105_v26 = vmul.f32 %v2979_v61, %v2104_v39 }
 0x4aa   :  { %v2106_v2 = vmul.f32 0.5, %v2105_v26 }
 0x4ac   :  { %v2107_v3 = vsub.f32 1.5, %v2106_v2 }
 0x4ad   :  { %v2981_v10 = vpop.eup %2980 }
 0x4ae   :  { %v2108_v1 = vmul.f32 %v2979_v61, %v2107_v3  ;;  %v2114_v47 = vmul.f32 %v2981_v10, %v2060_v40  ;;  %vm2120_vm15 = vweird.f32 %v2981_v10 }
 0x4af   :  { %vm2121_vm2 = vmor %vm2119_vm1, %vm2120_vm15 }
 0x4b0   :  { %v2112_v43 = vsel %vm2111_vm14, %v2979_v61, %v2108_v1  ;;  %v2115_v49 = vmul.f32 %v2981_v10, %v2114_v47  ;;  %v2863_v1 = vld [vmem:[%s3784_s9 + $0x10] sm:$0xff] }
 0x4b1   :  { %v2147_v53 = vmul.f32 %v2112_v43, %v3664_v30  ;;  %v2851_v30 = vld [vmem:[%s3780_s7] sm:$0xff] }
 0x4b2   :  { %v2116_v48 = vmul.f32 0.5, %v2115_v49  ;;  %2226 = vmatpush.bf16.msra.mxu3 %v2851_v30  ;;  %v2862_v49 = vld [vmem:[%s3784_s9 + $0x8] sm:$0xff]  ;;  %v2871_v30 = vld [vmem:[%s3782_s8] ss:$0 sm:$0xff] }
 0x4b3   :  { %2155 = vst.msk [vmem:[#allocation4 + $0x20] sm:$0xff] %vm183_vm0, %v2147_v53  ;;  %v2861_v53 = vld [vmem:[%s3784_s9] sm:$0xff] }
 0x4b4   :  { %v2117_v36 = vsub.f32 1.5, %v2116_v48 }
 0x4b6   :  { %v2118_v12 = vmul.f32 %v2981_v10, %v2117_v36  ;;  %2300 = vmatpush.bf16.msrb.mxu3 %v2858_v60 }
 0x4b8   :  { %v2122_v13 = vsel %vm2121_vm2, %v2981_v10, %v2118_v12  ;;  %v2864_v10 = vld [vmem:[%s3784_s9 + $0x18] sm:$0xff] }
 0x4b9   :  { %v2148_v19 = vmul.f32 %v2122_v13, %v3669_v38  ;;  %v2856_v38 = vld [vmem:[%s3780_s7 + $0x28] sm:$0xff]  ;;  %v2865_v13 = vld [vmem:[%s3781_s11] sm:$0xff] }
 0x4ba   :  { %2262 = vmatpush.bf16.msrb.mxu2 %v2856_v38  ;;  %2301 = vmatpush.bf16.msrb.mxu3 %v2857_v52 }
 0x4bb   :  { %2156 = vst.msk [vmem:[#allocation4 + $0x28] sm:$0xff] %vm183_vm0, %v2148_v19 }
 0x4bc   :  { %v2051_v18 = vpop.xlane.xlu0 %2050 }
 0x4bd   :  { %v2061_v56 = vmax.f32 %v2051_v18, 1e-24 }
 0x4be   :  { %2263 = vmatpush.bf16.msrb.mxu2 %v2855_v54  ;;  %v2358_v54 = vld [vmem:[%s3785_s13] sm:$0xff] }
 0x4bf   :  { %2982 = vrsqrt.f32 %v2061_v56  ;;  %vm2129_vm4 = vweird.f32 %v2061_v56 }
 0x4c4   :  { %v2054_v34 = vpop.xlane.xlu1 %2053 }
 0x4c5   :  { %v2983_v8 = vpop.eup %2982  ;;  %v2062_v24 = vmax.f32 %v2054_v34, 1e-24 }
 0x4c6   :  { %v2124_v58 = vmul.f32 %v2983_v8, %v2061_v56  ;;  %vm2130_vm3 = vweird.f32 %v2983_v8 }
 0x4c7   :  { %2984 = vrsqrt.f32 %v2062_v24  ;;  %vm2131_vm5 = vmor %vm2129_vm4, %vm2130_vm3  ;;  %vm2139_vm8 = vweird.f32 %v2062_v24 }
 0x4c8   :  { %v2125_v14 = vmul.f32 %v2983_v8, %v2124_v58 }
 0x4ca   :  { %v2126_v33 = vmul.f32 0.5, %v2125_v14 }
 0x4cc   :  { %v2127_v62 = vsub.f32 1.5, %v2126_v33 }
 0x4cd   :  { %v2985_v0 = vpop.eup %2984 }
 0x4ce   :  { %v2128_v29 = vmul.f32 %v2983_v8, %v2127_v62  ;;  %v2134_v9 = vmul.f32 %v2985_v0, %v2062_v24  ;;  %vm2140_vm6 = vweird.f32 %v2985_v0 }
 0x4cf   :  { %vm2141_vm9 = vmor %vm2139_vm8, %vm2140_vm6 }
 0x4d0   :  { %v2132_v7 = vsel %vm2131_vm5, %v2983_v8, %v2128_v29  ;;  %v2135_v44 = vmul.f32 %v2985_v0, %v2134_v9 }
 0x4d1   :  { %v2149_v63 = vmul.f32 %v2132_v7, %v3674_v15  ;;  %v2860_v15 = vld [vmem:[%s3780_s7 + $0x48] sm:$0xff] }
 0x4d2   :  { %v2136_v41 = vmul.f32 0.5, %v2135_v44 }
 0x4d3   :  { %2157 = vst.msk [vmem:[#allocation4 + $0x30] sm:$0xff] %vm183_vm0, %v2149_v63 }
 0x4d4   :  { %v2137_v45 = vsub.f32 1.5, %v2136_v41 }
 0x4d6   :  { %v2138_v50 = vmul.f32 %v2985_v0, %v2137_v45 }
 0x4d8   :  { %v2142_v6 = vsel %vm2141_vm9, %v2985_v0, %v2138_v50  ;;  %v2872_v0 = vld [vmem:[%s3783_s10] ss:$0 sm:$0xff] }
 0x4d9   :  { %v2150_v21 = vmul.f32 %v2142_v6, %v3679_v46  ;;  %v2866_v46 = vld [vmem:[%s3781_s11 + $0x8] sm:$0xff]  ;;  %v2420_v6 = vld [vmem:[%s3787_s14] sm:$0xff] }
 0x4da   :  { %2452 = vmatpush.bf16.msrb.mxu0 %v2866_v46 }
 0x4db   :  { %2158 = vst.msk [vmem:[#allocation4 + $0x38] sm:$0xff] %vm183_vm0, %v2150_v21 }
 0x4de   :  { %2453 = vmatpush.bf16.msrb.mxu0 %v2865_v13 }
 0x4e2   :  { %v2169_v42 = vld [vmem:[#allocation4 + $0x1] ss:$8 sm:$0xf0]  ;;  %v2160_v23 = vld [vmem:[#allocation4] ss:$8 sm:$0xf0] }
 0x4e3   :  { %v2170_v22 = vor.u32 %v2169_v42, %v2168_v16  ;;  %v2161_v17 = vor.u32 %v2160_v23, %v2159_v5  ;;  %v2234_v25 = vld [vmem:[#allocation4 + $0x2] ss:$8 sm:$0xf0]  ;;  %v2272_v32 = vld [vmem:[#allocation4 + $0x3] ss:$8 sm:$0xf0] }
 0x4e4   :  { %v2235_v11 = vor.u32 %v2234_v25, %v2233_v57  ;;  %v2273_v35 = vor.u32 %v2272_v32, %v2271_v55  ;;  %v2310_v4 = vld [vmem:[#allocation4 + $0x4] ss:$8 sm:$0xf0]  ;;  %v2873_v42 = vld [vmem:[%s3786_s12] ss:$0 sm:$0xff] }
 0x4e5   :  { %v2171_v59 = vpack.c.bf16 %v2170_v22, %v2170_v22  ;;  %v2162_v51 = vpack.c.bf16 %v2161_v17, %v2161_v17  ;;  %v2311_v61 = vor.u32 %v2310_v4, %v2309_v37 }
 0x4e6   :  { %v2236_v31 = vpack.c.bf16 %v2235_v11, %v2235_v11  ;;  %v2274_v27 = vpack.c.bf16 %v2273_v35, %v2273_v35 }
 0x4e7   :  { %2728 = vmatmul.msk.bf16.vlgmr.msra.gmra.mxu2 %vm183_vm0, %v2171_v59  ;;  %2737 = vmatmul.msk.bf16.vlgmr.msra.gmra.mxu3 %vm183_vm0, %v2162_v51  ;;  %v2312_v40 = vpack.c.bf16 %v2311_v61, %v2311_v61 }
 0x4e8   :  { %2338 = vmatpush.bf16.msra.mxu2 %v2860_v15  ;;  %2404 = vmatpush.bf16.msra.mxu3 %v2864_v10 }
 0x4ec   :  { %2339 = vmatpush.bf16.msra.mxu2 %v2859_v28  ;;  %2405 = vmatpush.bf16.msra.mxu3 %v2863_v1 }
 0x4f0   :  { %2406 = vmatpush.bf16.msra.mxu3 %v2862_v49 }
 0x4f4   :  { %2407 = vmatpush.bf16.msra.mxu3 %v2861_v53 }
 0x4f7   :  { %2746 = vmatmul.msk.bf16.vlgmr.msrb.gmra.mxu2 %vm183_vm0, %v2236_v31  ;;  %2755 = vmatmul.msk.bf16.vlgmr.msrb.gmra.mxu3 %vm183_vm0, %v2274_v27 }
 0x507   :  { %2764 = vmatmul.msk.bf16.vlgmr.msra.gmra.mxu2 %vm183_vm0, %v2312_v40 }
 0x56a   :  { %v2200_v39 = vpop.f32.mrf.mxu2  ;;  %v2228_v26 = vpop.f32.mrf.mxu3 }
 0x56b   :  { %v2229_v12 = vadd.f32 %v2228_v26, %v2200_v39 }
 0x572   :  { %v2202_v2 = vpop.f32.mrf.mxu2  ;;  %v2230_v3 = vpop.f32.mrf.mxu3 }
 0x57a   :  { %v2265_v47 = vpop.f32.mrf.mxu2  ;;  %v2303_v43 = vpop.f32.mrf.mxu3 }
 0x57b   :  { %v2269_v19 = vadd.f32 %v2265_v47, %v2229_v12 }
 0x57d   :  { %v2307_v20 = vadd.f32 %v2303_v43, %v2269_v19 }
 0x582   :  { %v2267_v48 = vpop.f32.mrf.mxu2  ;;  %v2305_v36 = vpop.f32.mrf.mxu3 }
 0x58a   :  { %v2341_v18 = vpop.f32.mrf.mxu2 }
 0x58b   :  { %v2345_v56 = vadd.f32 %v2341_v18, %v2307_v20 }
 0x58d   :  { %v2350_v34 = vadd.f32 %v2871_v30, %v2345_v56 }
 0x58f   :  { %v2352_v8 = vmul.f32 1.442695, %v2350_v34  ;;  %vm2351_vm10 = vcmp.gt.f32.partialorder %v2350_v34, 0.0 }
 0x591   :  { %2986 = vpow2.f32 %v2352_v8 }
 0x592   :  { %v2343_v24 = vpop.f32.mrf.mxu2 }
 0x597   :  { %v2987_v58 = vpop.eup %2986 }
 0x598   :  { %v2765_v38 = vadd.f32 -1.0, %v2987_v58 }
 0x59a   :  { %v2355_v14 = vmul.f32 1.6732632, %v2765_v38 }
 0x59c   :  { %v2356_v60 = vsel %vm2351_vm10, %v2350_v34, %v2355_v14 }
 0x59d   :  { %v2357_v33 = vmul.f32 1.050701, %v2356_v60 }
 0x59f   :  { %v2359_v52 = vmul.f32 %v2358_v54, %v2357_v33 }
 0x5a1   :  { %v2360_v62 = vpack.c.bf16 %v2359_v52, %v2359_v52 }
 0x5a3   :  { %2782 = vmatmul.msk.bf16.vlgmr.msra.gmra.mxu3 %vm1561_vm7, %v2360_v62 }
 0x626   :  { %v2409_v29 = vpop.f32.mrf.mxu3 }
 0x627   :  { %v2410_v9 = vadd.f32 %v2872_v0, %v2409_v29 }
 0x629   :  { %v2414_v7 = vmul.f32 1.442695, %v2410_v9  ;;  %vm2413_vm11 = vcmp.gt.f32.partialorder %v2410_v9, 0.0 }
 0x62b   :  { %2988 = vpow2.f32 %v2414_v7 }
 0x62e   :  { %v2411_v44 = vpop.f32.mrf.mxu3 }
 0x631   :  { %v2989_v63 = vpop.eup %2988 }
 0x632   :  { %v2783_v41 = vadd.f32 -1.0, %v2989_v63 }
 0x634   :  { %v2417_v45 = vmul.f32 1.6732632, %v2783_v41 }
 0x636   :  { %v2418_v50 = vsel %vm2413_vm11, %v2410_v9, %v2417_v45 }
 0x637   :  { %v2419_v21 = vmul.f32 1.050701, %v2418_v50 }
 0x639   :  { %v2421_v16 = vmul.f32 %v2420_v6, %v2419_v21 }
 0x63b   :  { %v2422_v5 = vpack.c.bf16 %v2421_v16, %v2421_v16 }
 0x63d   :  { %2792 = vmatmul.msk.bf16.vlgmr.msrb.gmra.mxu0 %vm183_vm0, %v2422_v5 }
 0x6ba   :  { %v2455_v23 = vpop.f32.mrf.mxu0 }
 0x6bb   :  { %v2456_v22 = vadd.f32 %v2873_v42, %v2455_v23 }
 0x6bd   :  { %2459 = vst [vmem:[%s3788_s15] sm:$0xff] %v2456_v22 }
 0x6c2   :  { %v2457_v17 = vpop.f32.mrf.mxu0 }

</bundles_post_ra>
